<compile_context>
chip_gen: v5e
topology: v5e:2x2
jax: 0.10.0
libtpu: 0.0.40
codegen_flags: <defaults>
</compile_context>

<pallas_src>
import functools

import jax
import jax.numpy as jnp
from jax import lax
from jax.experimental import pallas as pl
from jax.experimental.pallas import tpu as pltpu

_BN_EPS = 1e-5


def _pick_row_tile(n_tgt, n_src, knn_bytes_budget=8 << 20):
    """Target-row tile size.

    The kNN phase keeps ~5 live (tn, n_src) f32/i32 arrays (~20*tn*n_src bytes)
    that Mosaic spills to VMEM; cap tn so that footprint stays in the low-MB
    range. Prefer >=8 grid steps (>=4 minimum) so the 'parallel' grid axis shards
    across v7x's 2 TensorCores and still pipelines per core.
    """
    cap = max(8, min(256, knn_bytes_budget // max(20 * n_src, 1)))
    for min_steps in (8, 4, 2, 1):
        for t in (256, 128, 64, 32, 16, 8):
            if t <= cap and n_tgt % t == 0 and n_tgt // t >= min_steps:
                return t
    for t in range(min(cap, n_tgt), 0, -1):  # fallback: any divisor <= cap
        if n_tgt % t == 0:
            return t
    return n_tgt


# --------------------------------------------------------------------------
# Fused FPModule kernel: knn_interpolate + concat + MLP
# --------------------------------------------------------------------------

def _make_fp_kernel(k, n_lin):
    n_w = 2 * n_lin + 1  # [w1a, w1b, b1, w2, b2, ...]  (BN scale pre-folded)

    def kernel(*refs):
        pt_ref, bt_ref, psT_ref, bs_ref, xs_ref, xsk_ref = refs[:6]
        w_refs = refs[6:6 + n_w]
        o_ref = refs[6 + n_w]

        pt = pt_ref[...]                       # (tn, 3)  target positions (f32)
        psT = psT_ref[...]                     # (3, S)   source positions^T (f32)
        tn = pt.shape[0]
        s = psT.shape[1]

        # --- exact squared distances (f32, VPU; D=3, kept in (a-b)^2 form because
        #     the 1/d^2 weights are cancellation-sensitive) ---
        d = jnp.zeros((tn, s), jnp.float32)
        for c in range(3):
            diff = pt[:, c:c + 1] - psT[c:c + 1, :]          # (tn,1)-(1,S) -> (tn,S)
            d = d + diff * diff

        # --- cross-batch mask built in-kernel from the int batch vectors ---
        same = bt_ref[...] == bs_ref[...]                     # (tn,1)==(1,S) -> (tn,S)
        inf = jnp.float32(jnp.inf)
        d = jnp.where(same, d, inf)

        # --- fused exact k-NN selection -> sparse inverse-sq-dist weight matrix.
        #     Two lane reductions per iteration (min + tie-breaking argmin); k is
        #     small, fuse only if a bundle dump shows XLU as the binding slot.
        #     Degenerate rows (fewer than k / zero same-batch sources) get weight 0
        #     from the masked-to-inf entries (1/inf == 0), i.e. output 0, not NaN.
        col = lax.broadcasted_iota(jnp.int32, d.shape, 1)
        wsel = jnp.zeros_like(d)                              # (tn, S)
        wsum = jnp.zeros((tn, 1), jnp.float32)
        for _ in range(k):                                    # static, k is small
            dmin = jnp.min(d, axis=1, keepdims=True)          # (tn,1)
            hit = d == dmin
            amin = jnp.min(jnp.where(hit, col, s), axis=1, keepdims=True)
            sel = col == amin                                 # exactly one per row
            w = 1.0 / jnp.maximum(dmin, 1e-16)                # torch_geometric clamp
            wsel = jnp.where(sel, w, wsel)
            wsum = wsum + w
            d = jnp.where(sel, inf, d)

        # --- weighted gather as one bf16 MXU matmul (f32 acc) + f32 normalization ---
        y = jnp.dot(wsel.astype(jnp.bfloat16), xs_ref[...],
                    preferred_element_type=jnp.float32)       # (tn, C_in)
        y = y * (1.0 / jnp.maximum(wsum, 1e-30))

        # --- concat([interp, x_skip]) @ W1 as a split matmul (no concat) ---
        #     BN(eval, default stats) scale is pre-folded into weights/biases.
        w1a, w1b, b1 = w_refs[0], w_refs[1], w_refs[2]
        h = jnp.dot(y.astype(jnp.bfloat16), w1a[...],
                    preferred_element_type=jnp.float32)
        h = h + jnp.dot(xsk_ref[...].astype(jnp.bfloat16), w1b[...],
                        preferred_element_type=jnp.float32)
        h = jnp.maximum(h + b1[...], 0.0)

        for l in range(1, n_lin):
            w_l = w_refs[3 + 2 * (l - 1)]
            b_l = w_refs[4 + 2 * (l - 1)]
            h = jnp.dot(h.astype(jnp.bfloat16), w_l[...],
                        preferred_element_type=jnp.float32)
            h = jnp.maximum(h + b_l[...], 0.0)

        o_ref[...] = h.astype(o_ref.dtype)

    return kernel


def fp_module_forward(mlp_params, x, pos, batch, x_skip, pos_skip, batch_skip, *,
                      k, single_buffer_invariants=True):
    """FPModule.forward. Returns (features, pos_skip, batch_skip)."""
    n_src, c_in = x.shape
    n_tgt, c_skip = x_skip.shape

    # layout prep (plain JAX, cheap): source positions transposed, batch ids 2-D,
    # source features in bf16 (native MXU rate for the gather matmul, half the VMEM).
    pos_sT = jnp.transpose(pos).astype(jnp.float32)           # (3, S)
    bt = batch_skip.astype(jnp.int32).reshape(n_tgt, 1)       # (T, 1)
    bs = batch.astype(jnp.int32).reshape(1, n_src)            # (1, S)
    x_bf = x.astype(jnp.bfloat16)                             # (S, C_in)

    # BN(eval, PyTorch-default stats: mean=0, var=1, affine=identity) reduces to a
    # constant positive scale; fold it into weights/biases (ReLU commutes with it).
    bn_scale = float(1.0 / (1.0 + _BN_EPS) ** 0.5)

    def _fold(a):
        return (a.astype(jnp.float32) * bn_scale).astype(a.dtype)

    # flatten MLP params; split first weight into [interp | skip] halves so the
    # channel concat never materializes.
    w1, b1 = mlp_params[0]
    flat = [_fold(w1[:c_in]), _fold(w1[c_in:]), _fold(b1)]
    for (w, b) in mlp_params[1:]:
        flat += [_fold(w), _fold(b)]
    n_lin = len(mlp_params)
    c_out = mlp_params[-1][0].shape[1]

    tn = _pick_row_tile(n_tgt, n_src)

    # Grid-invariant blocks (source data + weights): DMA'd once; single-buffer them
    # so Pallas does not hold two copies (important on v7x's 64 MiB VMEM).
    inv_mode = pl.Buffered(1) if single_buffer_invariants else None

    def inv_spec(shape):
        index_map = lambda i, _nd=len(shape): (0,) * _nd
        if inv_mode is None:
            return pl.BlockSpec(shape, index_map)
        return pl.BlockSpec(shape, index_map, pipeline_mode=inv_mode)

    in_specs = [
        pl.BlockSpec((tn, 3), lambda i: (i, 0)),          # pos_skip tile
        pl.BlockSpec((tn, 1), lambda i: (i, 0)),          # batch_skip tile
        inv_spec((3, n_src)),                             # pos^T (full source block)
        inv_spec((1, n_src)),                             # batch (full)
        inv_spec((n_src, c_in)),                          # x (full, bf16)
        pl.BlockSpec((tn, c_skip), lambda i: (i, 0)),     # x_skip tile
    ]
    for t in flat:                                        # MLP weights / biases (full)
        in_specs.append(inv_spec(t.shape))

    # VMEM budget from the actual resident buffers, capped by physical VMEM.
    def _nbytes(a):
        return int(a.size) * int(a.dtype.itemsize)

    invariant_bytes = (_nbytes(pos_sT) + _nbytes(bs) + _nbytes(x_bf)
                       + sum(_nbytes(t) for t in flat))
    if not single_buffer_invariants:
        invariant_bytes *= 2
    per_step_bytes = 2 * (tn * 3 * 4 + tn * 4 + tn * c_skip * 4 + tn * c_out * 4)
    spill_headroom = 20 * tn * n_src + (8 << 20)          # kNN temporaries + slack
    need = invariant_bytes + per_step_bytes + spill_headroom
    try:
        phys_vmem = int(pltpu.get_tpu_info().vmem_capacity_bytes)
    except Exception:  # pragma: no cover - info query unavailable
        phys_vmem = 64 << 20
    vmem_limit = int(max(16 << 20, min(need, int(phys_vmem * 0.85))))

    out = pl.pallas_call(
        _make_fp_kernel(k, n_lin),
        out_shape=jax.ShapeDtypeStruct((n_tgt, c_out), jnp.float32),
        grid_spec=pltpu.PrefetchScalarGridSpec(
            num_scalar_prefetch=0,
            grid=(n_tgt // tn,),
            in_specs=in_specs,
            out_specs=pl.BlockSpec((tn, c_out), lambda i: (i, 0)),
        ),
        compiler_params=pltpu.CompilerParams(
            dimension_semantics=("parallel",),
            vmem_limit_bytes=vmem_limit,
        ),
    )(pos_skip, bt, pos_sT, bs, x_bf, x_skip, *flat)
    return out, pos_skip, batch_skip
    # TODO(synk): for very large source sets, tile the source axis too (running
    # k-best merge over S-chunks via a second 'arbitrary' grid axis / emit_pipeline)
    # so the (tn,S) temporaries and the (S,C_in) feature slab need not be resident.


# --------------------------------------------------------------------------
# Parameters for self.nn (PyG-style MLP: [Lin -> ReLU -> BN] per block)
# --------------------------------------------------------------------------
# TODO(synk): self.nn is an arbitrary nn.Module argument; modeled here as the
# torch_geometric MLP used by PointNet++ FP modules with BN in eval mode (note
# torch_geometric's plain_last=True would skip norm/act on the final layer).

def init_mlp_params(key, channels):
    params = []
    keys = jax.random.split(key, len(channels) - 1)
    for i, kk in enumerate(keys):
        cin, cout = channels[i], channels[i + 1]
        kw, kb = jax.random.split(kk)
        bound = 1.0 / (cin ** 0.5)
        w = jax.random.uniform(kw, (cin, cout), jnp.float32, -bound, bound)
        b = jax.random.uniform(kb, (cout,), jnp.float32, -bound, bound)
        params.append((w.astype(jnp.bfloat16), b.reshape(1, cout)))  # bf16 weights
    return params


# --------------------------------------------------------------------------
# Pure-JAX reference (for correctness check)
# --------------------------------------------------------------------------

def fp_module_ref(mlp_params, x, pos, batch, x_skip, pos_skip, batch_skip, *, k):
    d = jnp.sum((pos_skip[:, None, :] - pos[None, :, :]) ** 2, axis=-1)
    same = batch_skip[:, None] == batch[None, :]
    d = jnp.where(same, d, jnp.inf)
    neg_topk, idx = jax.lax.top_k(-d, k)
    w = 1.0 / jnp.maximum(-neg_topk, 1e-16)                    # (T, k)
    y = jnp.sum(w[..., None] * x[idx], axis=1) / jnp.sum(w, axis=1, keepdims=True)
    h = jnp.concatenate([y, x_skip], axis=1)
    bn_scale = 1.0 / (1.0 + _BN_EPS) ** 0.5
    for wgt, b in mlp_params:
        h = jnp.maximum(h @ wgt.astype(jnp.float32) + b, 0.0) * bn_scale
    return h


if __name__ == "__main__":
    k = 3
    num_batches = 2
    src_per_cloud, tgt_per_cloud = 32, 64
    n_src = src_per_cloud * num_batches        # coarse level: x, pos, batch
    n_tgt = tgt_per_cloud * num_batches        # fine (skip) level
    c_in, c_skip = 64, 64
    mlp_channels = (c_in + c_skip, 128, 128)   # lane-dense 128-wide output

    key = jax.random.PRNGKey(0)
    k1, k2, k3, k4, k5 = jax.random.split(key, 5)
    x = jax.random.normal(k1, (n_src, c_in), jnp.float32)
    pos = jax.random.normal(k2, (n_src, 3), jnp.float32)
    x_skip = jax.random.normal(k3, (n_tgt, c_skip), jnp.float32)
    pos_skip = jax.random.normal(k4, (n_tgt, 3), jnp.float32)
    batch = jnp.repeat(jnp.arange(num_batches, dtype=jnp.int32), src_per_cloud)
    batch_skip = jnp.repeat(jnp.arange(num_batches, dtype=jnp.int32), tgt_per_cloud)

    params = init_mlp_params(k5, mlp_channels)

    def _run(single_buffer):
        fwd = jax.jit(functools.partial(fp_module_forward, k=k,
                                        single_buffer_invariants=single_buffer))
        o, p, b = fwd(params, x, pos, batch, x_skip, pos_skip, batch_skip)
        return jax.block_until_ready(o), p, b

    try:
        out, pos_out, batch_out = _run(True)
    except Exception:
        # Fallback if this JAX build rejects Buffered(1) single-buffering.
        out, pos_out, batch_out = _run(False)

    assert out.shape == (n_tgt, mlp_channels[-1]), out.shape
    assert pos_out.shape == pos_skip.shape and batch_out.shape == batch_skip.shape
    assert bool(jnp.all(jnp.isfinite(out)))

    ref = fp_module_ref(params, x, pos, batch, x_skip, pos_skip, batch_skip, k=k)
    err = float(jnp.max(jnp.abs(out - ref)))
    assert bool(jnp.allclose(out, ref, atol=1e-1, rtol=5e-2)), err

    print("KERNEL_OK")
</pallas_src>

<mosaic_0001>
module attributes {stable_mosaic.version = 11 : i64} {
  func.func @kernel(%arg0: i32, %arg1: memref<16x3xf32, #tpu.memory_space<vmem>>, %arg2: memref<16x1xi32, #tpu.memory_space<vmem>>, %arg3: memref<3x64xf32, #tpu.memory_space<vmem>>, %arg4: memref<1x64xi32, #tpu.memory_space<vmem>>, %arg5: memref<64x64xbf16, #tpu.memory_space<vmem>>, %arg6: memref<16x64xf32, #tpu.memory_space<vmem>>, %arg7: memref<64x128xbf16, #tpu.memory_space<vmem>>, %arg8: memref<64x128xbf16, #tpu.memory_space<vmem>>, %arg9: memref<1x128xf32, #tpu.memory_space<vmem>>, %arg10: memref<128x128xbf16, #tpu.memory_space<vmem>>, %arg11: memref<1x128xf32, #tpu.memory_space<vmem>>, %arg12: memref<16x128xf32, #tpu.memory_space<vmem>>) attributes {dimension_semantics = [#tpu.dimension_semantics<parallel>], iteration_bounds = array<i64: 8>, scalar_prefetch = 0 : i64, scratch_operands = 0 : i64, tpu.core_type = #tpu.core_type<tc>, window_params = [{transform_indices = @transform_0, window_bounds = array<i64: 16, 3>}, {transform_indices = @transform_1, window_bounds = array<i64: 16, 1>}, {pipeline_mode = #tpu.pipeline_mode<synchronous>, transform_indices = @transform_2, window_bounds = array<i64: 3, 64>}, {pipeline_mode = #tpu.pipeline_mode<synchronous>, transform_indices = @transform_3, window_bounds = array<i64: 1, 64>}, {pipeline_mode = #tpu.pipeline_mode<synchronous>, transform_indices = @transform_4, window_bounds = array<i64: 64, 64>}, {transform_indices = @transform_5, window_bounds = array<i64: 16, 64>}, {pipeline_mode = #tpu.pipeline_mode<synchronous>, transform_indices = @transform_6, window_bounds = array<i64: 64, 128>}, {pipeline_mode = #tpu.pipeline_mode<synchronous>, transform_indices = @transform_7, window_bounds = array<i64: 64, 128>}, {pipeline_mode = #tpu.pipeline_mode<synchronous>, transform_indices = @transform_8, window_bounds = array<i64: 1, 128>}, {pipeline_mode = #tpu.pipeline_mode<synchronous>, transform_indices = @transform_9, window_bounds = array<i64: 128, 128>}, {pipeline_mode = #tpu.pipeline_mode<synchronous>, transform_indices = @transform_10, window_bounds = array<i64: 1, 128>}, {transform_indices = @transform_11, window_bounds = array<i64: 16, 128>}]} {
    %c0 = arith.constant 0 : index
    %c0_0 = arith.constant 0 : index
    %0 = vector.load %arg1[%c0, %c0_0] : memref<16x3xf32, #tpu.memory_space<vmem>>, vector<16x3xf32>
    %c0_1 = arith.constant 0 : index
    %c0_2 = arith.constant 0 : index
    %1 = vector.load %arg3[%c0_1, %c0_2] : memref<3x64xf32, #tpu.memory_space<vmem>>, vector<3x64xf32>
    %cst = arith.constant 0.000000e+00 : f32
    %2 = vector.broadcast %cst : f32 to vector<16x64xf32>
    %3 = vector.extract_strided_slice %0 {offsets = [0, 0], sizes = [16, 1], strides = [1, 1]} : vector<16x3xf32> to vector<16x1xf32>
    %4 = vector.extract_strided_slice %1 {offsets = [0, 0], sizes = [1, 64], strides = [1, 1]} : vector<3x64xf32> to vector<1x64xf32>
    %5 = vector.broadcast %3 : vector<16x1xf32> to vector<16x64xf32>
    %6 = vector.broadcast %4 : vector<1x64xf32> to vector<16x64xf32>
    %7 = arith.subf %5, %6 : vector<16x64xf32>
    %8 = arith.mulf %7, %7 : vector<16x64xf32>
    %9 = arith.addf %2, %8 : vector<16x64xf32>
    %10 = vector.extract_strided_slice %0 {offsets = [0, 1], sizes = [16, 1], strides = [1, 1]} : vector<16x3xf32> to vector<16x1xf32>
    %11 = vector.extract_strided_slice %1 {offsets = [1, 0], sizes = [1, 64], strides = [1, 1]} : vector<3x64xf32> to vector<1x64xf32>
    %12 = vector.broadcast %10 : vector<16x1xf32> to vector<16x64xf32>
    %13 = vector.broadcast %11 : vector<1x64xf32> to vector<16x64xf32>
    %14 = arith.subf %12, %13 : vector<16x64xf32>
    %15 = arith.mulf %14, %14 : vector<16x64xf32>
    %16 = arith.addf %9, %15 : vector<16x64xf32>
    %17 = vector.extract_strided_slice %0 {offsets = [0, 2], sizes = [16, 1], strides = [1, 1]} : vector<16x3xf32> to vector<16x1xf32>
    %18 = vector.extract_strided_slice %1 {offsets = [2, 0], sizes = [1, 64], strides = [1, 1]} : vector<3x64xf32> to vector<1x64xf32>
    %19 = vector.broadcast %17 : vector<16x1xf32> to vector<16x64xf32>
    %20 = vector.broadcast %18 : vector<1x64xf32> to vector<16x64xf32>
    %21 = arith.subf %19, %20 : vector<16x64xf32>
    %22 = arith.mulf %21, %21 : vector<16x64xf32>
    %23 = arith.addf %16, %22 : vector<16x64xf32>
    %c0_3 = arith.constant 0 : index
    %c0_4 = arith.constant 0 : index
    %24 = vector.load %arg2[%c0_3, %c0_4] : memref<16x1xi32, #tpu.memory_space<vmem>>, vector<16x1xi32>
    %c0_5 = arith.constant 0 : index
    %c0_6 = arith.constant 0 : index
    %25 = vector.load %arg4[%c0_5, %c0_6] : memref<1x64xi32, #tpu.memory_space<vmem>>, vector<1x64xi32>
    %26 = vector.broadcast %24 : vector<16x1xi32> to vector<16x64xi32>
    %27 = vector.broadcast %25 : vector<1x64xi32> to vector<16x64xi32>
    %28 = arith.cmpi eq, %26, %27 : vector<16x64xi32>
    %cst_7 = arith.constant 0x7F800000 : f32
    %29 = vector.broadcast %cst_7 : f32 to vector<16x64xf32>
    %30 = arith.select %28, %23, %29 : vector<16x64xi1>, vector<16x64xf32>
    %31 = tpu.iota {dimensions = array<i32: 1>} : vector<16x64xi32>
    %cst_8 = arith.constant 0.000000e+00 : f32
    %32 = vector.broadcast %cst_8 : f32 to vector<16x64xf32>
    %cst_9 = arith.constant 0.000000e+00 : f32
    %33 = vector.broadcast %cst_9 : f32 to vector<16x1xf32>
    %cst_10 = arith.constant dense<0x7F800000> : vector<16xf32>
    %34 = vector.multi_reduction <minimumf>, %30, %cst_10 [1] : vector<16x64xf32> to vector<16xf32>
    %35 = vector.shape_cast %34 : vector<16xf32> to vector<16x1xf32>
    %36 = vector.broadcast %35 : vector<16x1xf32> to vector<16x64xf32>
    %37 = arith.cmpf oeq, %30, %36 : vector<16x64xf32>
    %c64_i32 = arith.constant 64 : i32
    %38 = vector.broadcast %c64_i32 : i32 to vector<16x64xi32>
    %39 = arith.select %37, %31, %38 : vector<16x64xi1>, vector<16x64xi32>
    %cst_11 = arith.constant dense<2147483647> : vector<16xi32>
    %40 = vector.multi_reduction <minsi>, %39, %cst_11 [1] : vector<16x64xi32> to vector<16xi32>
    %41 = vector.shape_cast %40 : vector<16xi32> to vector<16x1xi32>
    %42 = vector.broadcast %41 : vector<16x1xi32> to vector<16x64xi32>
    %43 = arith.cmpi eq, %31, %42 : vector<16x64xi32>
    %cst_12 = arith.constant 1.000000e-16 : f32
    %44 = vector.broadcast %cst_12 : f32 to vector<16x1xf32>
    %45 = arith.maximumf %35, %44 : vector<16x1xf32>
    %cst_13 = arith.constant 1.000000e+00 : f32
    %46 = vector.broadcast %cst_13 : f32 to vector<16x1xf32>
    %47 = arith.divf %46, %45 : vector<16x1xf32>
    %48 = vector.shape_cast %47 : vector<16x1xf32> to vector<16x1xf32>
    %49 = vector.broadcast %48 : vector<16x1xf32> to vector<16x64xf32>
    %50 = arith.select %43, %49, %32 : vector<16x64xi1>, vector<16x64xf32>
    %51 = arith.addf %33, %47 : vector<16x1xf32>
    %cst_14 = arith.constant 0x7F800000 : f32
    %52 = vector.broadcast %cst_14 : f32 to vector<16x64xf32>
    %53 = arith.select %43, %52, %30 : vector<16x64xi1>, vector<16x64xf32>
    %cst_15 = arith.constant dense<0x7F800000> : vector<16xf32>
    %54 = vector.multi_reduction <minimumf>, %53, %cst_15 [1] : vector<16x64xf32> to vector<16xf32>
    %55 = vector.shape_cast %54 : vector<16xf32> to vector<16x1xf32>
    %56 = vector.broadcast %55 : vector<16x1xf32> to vector<16x64xf32>
    %57 = arith.cmpf oeq, %53, %56 : vector<16x64xf32>
    %c64_i32_16 = arith.constant 64 : i32
    %58 = vector.broadcast %c64_i32_16 : i32 to vector<16x64xi32>
    %59 = arith.select %57, %31, %58 : vector<16x64xi1>, vector<16x64xi32>
    %cst_17 = arith.constant dense<2147483647> : vector<16xi32>
    %60 = vector.multi_reduction <minsi>, %59, %cst_17 [1] : vector<16x64xi32> to vector<16xi32>
    %61 = vector.shape_cast %60 : vector<16xi32> to vector<16x1xi32>
    %62 = vector.broadcast %61 : vector<16x1xi32> to vector<16x64xi32>
    %63 = arith.cmpi eq, %31, %62 : vector<16x64xi32>
    %cst_18 = arith.constant 1.000000e-16 : f32
    %64 = vector.broadcast %cst_18 : f32 to vector<16x1xf32>
    %65 = arith.maximumf %55, %64 : vector<16x1xf32>
    %cst_19 = arith.constant 1.000000e+00 : f32
    %66 = vector.broadcast %cst_19 : f32 to vector<16x1xf32>
    %67 = arith.divf %66, %65 : vector<16x1xf32>
    %68 = vector.shape_cast %67 : vector<16x1xf32> to vector<16x1xf32>
    %69 = vector.broadcast %68 : vector<16x1xf32> to vector<16x64xf32>
    %70 = arith.select %63, %69, %50 : vector<16x64xi1>, vector<16x64xf32>
    %71 = arith.addf %51, %67 : vector<16x1xf32>
    %cst_20 = arith.constant 0x7F800000 : f32
    %72 = vector.broadcast %cst_20 : f32 to vector<16x64xf32>
    %73 = arith.select %63, %72, %53 : vector<16x64xi1>, vector<16x64xf32>
    %cst_21 = arith.constant dense<0x7F800000> : vector<16xf32>
    %74 = vector.multi_reduction <minimumf>, %73, %cst_21 [1] : vector<16x64xf32> to vector<16xf32>
    %75 = vector.shape_cast %74 : vector<16xf32> to vector<16x1xf32>
    %76 = vector.broadcast %75 : vector<16x1xf32> to vector<16x64xf32>
    %77 = arith.cmpf oeq, %73, %76 : vector<16x64xf32>
    %c64_i32_22 = arith.constant 64 : i32
    %78 = vector.broadcast %c64_i32_22 : i32 to vector<16x64xi32>
    %79 = arith.select %77, %31, %78 : vector<16x64xi1>, vector<16x64xi32>
    %cst_23 = arith.constant dense<2147483647> : vector<16xi32>
    %80 = vector.multi_reduction <minsi>, %79, %cst_23 [1] : vector<16x64xi32> to vector<16xi32>
    %81 = vector.shape_cast %80 : vector<16xi32> to vector<16x1xi32>
    %82 = vector.broadcast %81 : vector<16x1xi32> to vector<16x64xi32>
    %83 = arith.cmpi eq, %31, %82 : vector<16x64xi32>
    %cst_24 = arith.constant 1.000000e-16 : f32
    %84 = vector.broadcast %cst_24 : f32 to vector<16x1xf32>
    %85 = arith.maximumf %75, %84 : vector<16x1xf32>
    %cst_25 = arith.constant 1.000000e+00 : f32
    %86 = vector.broadcast %cst_25 : f32 to vector<16x1xf32>
    %87 = arith.divf %86, %85 : vector<16x1xf32>
    %88 = vector.shape_cast %87 : vector<16x1xf32> to vector<16x1xf32>
    %89 = vector.broadcast %88 : vector<16x1xf32> to vector<16x64xf32>
    %90 = arith.select %83, %89, %70 : vector<16x64xi1>, vector<16x64xf32>
    %91 = arith.addf %71, %87 : vector<16x1xf32>
    %92 = arith.truncf %90 : vector<16x64xf32> to vector<16x64xbf16>
    %c0_26 = arith.constant 0 : index
    %c0_27 = arith.constant 0 : index
    %93 = vector.load %arg5[%c0_26, %c0_27] : memref<64x64xbf16, #tpu.memory_space<vmem>>, vector<64x64xbf16>
    %cst_28 = arith.constant dense<0.000000e+00> : vector<16x64xf32>
    %94 = tpu.matmul %92, %93, %cst_28 {dimension_numbers = #tpu.dot_dimension_numbers<[1], [0], [0], [1], [0, 0, 1, 1], [], []>} : vector<16x64xbf16>, vector<64x64xbf16>, vector<16x64xf32> -> vector<16x64xf32>
    %cst_29 = arith.constant 1.000000e-30 : f32
    %95 = vector.broadcast %cst_29 : f32 to vector<16x1xf32>
    %96 = arith.maximumf %91, %95 : vector<16x1xf32>
    %cst_30 = arith.constant 1.000000e+00 : f32
    %97 = vector.broadcast %cst_30 : f32 to vector<16x1xf32>
    %98 = arith.divf %97, %96 : vector<16x1xf32>
    %99 = vector.broadcast %98 : vector<16x1xf32> to vector<16x64xf32>
    %100 = arith.mulf %94, %99 : vector<16x64xf32>
    %101 = arith.truncf %100 : vector<16x64xf32> to vector<16x64xbf16>
    %c0_31 = arith.constant 0 : index
    %c0_32 = arith.constant 0 : index
    %102 = vector.load %arg7[%c0_31, %c0_32] : memref<64x128xbf16, #tpu.memory_space<vmem>>, vector<64x128xbf16>
    %cst_33 = arith.constant dense<0.000000e+00> : vector<16x128xf32>
    %103 = tpu.matmul %101, %102, %cst_33 {dimension_numbers = #tpu.dot_dimension_numbers<[1], [0], [0], [1], [0, 0, 1, 1], [], []>} : vector<16x64xbf16>, vector<64x128xbf16>, vector<16x128xf32> -> vector<16x128xf32>
    %c0_34 = arith.constant 0 : index
    %c0_35 = arith.constant 0 : index
    %104 = vector.load %arg6[%c0_34, %c0_35] : memref<16x64xf32, #tpu.memory_space<vmem>>, vector<16x64xf32>
    %105 = arith.truncf %104 : vector<16x64xf32> to vector<16x64xbf16>
    %c0_36 = arith.constant 0 : index
    %c0_37 = arith.constant 0 : index
    %106 = vector.load %arg8[%c0_36, %c0_37] : memref<64x128xbf16, #tpu.memory_space<vmem>>, vector<64x128xbf16>
    %cst_38 = arith.constant dense<0.000000e+00> : vector<16x128xf32>
    %107 = tpu.matmul %105, %106, %cst_38 {dimension_numbers = #tpu.dot_dimension_numbers<[1], [0], [0], [1], [0, 0, 1, 1], [], []>} : vector<16x64xbf16>, vector<64x128xbf16>, vector<16x128xf32> -> vector<16x128xf32>
    %108 = arith.addf %103, %107 : vector<16x128xf32>
    %c0_39 = arith.constant 0 : index
    %c0_40 = arith.constant 0 : index
    %109 = vector.load %arg9[%c0_39, %c0_40] : memref<1x128xf32, #tpu.memory_space<vmem>>, vector<1x128xf32>
    %110 = vector.broadcast %109 : vector<1x128xf32> to vector<16x128xf32>
    %111 = arith.addf %108, %110 : vector<16x128xf32>
    %cst_41 = arith.constant 0.000000e+00 : f32
    %112 = vector.broadcast %cst_41 : f32 to vector<16x128xf32>
    %113 = arith.maximumf %111, %112 : vector<16x128xf32>
    %114 = arith.truncf %113 : vector<16x128xf32> to vector<16x128xbf16>
    %c0_42 = arith.constant 0 : index
    %c0_43 = arith.constant 0 : index
    %115 = vector.load %arg10[%c0_42, %c0_43] : memref<128x128xbf16, #tpu.memory_space<vmem>>, vector<128x128xbf16>
    %cst_44 = arith.constant dense<0.000000e+00> : vector<16x128xf32>
    %116 = tpu.matmul %114, %115, %cst_44 {dimension_numbers = #tpu.dot_dimension_numbers<[1], [0], [0], [1], [0, 0, 1, 1], [], []>} : vector<16x128xbf16>, vector<128x128xbf16>, vector<16x128xf32> -> vector<16x128xf32>
    %c0_45 = arith.constant 0 : index
    %c0_46 = arith.constant 0 : index
    %117 = vector.load %arg11[%c0_45, %c0_46] : memref<1x128xf32, #tpu.memory_space<vmem>>, vector<1x128xf32>
    %118 = vector.broadcast %117 : vector<1x128xf32> to vector<16x128xf32>
    %119 = arith.addf %116, %118 : vector<16x128xf32>
    %cst_47 = arith.constant 0.000000e+00 : f32
    %120 = vector.broadcast %cst_47 : f32 to vector<16x128xf32>
    %121 = arith.maximumf %119, %120 : vector<16x128xf32>
    %c0_48 = arith.constant 0 : index
    %c0_49 = arith.constant 0 : index
    %122 = vector.load %arg12[%c0_48, %c0_49] : memref<16x128xf32, #tpu.memory_space<vmem>>, vector<16x128xf32>
    tpu.vector_store %arg12[%c0_48, %c0_49], %121 {strides = array<i32>} : memref<16x128xf32, #tpu.memory_space<vmem>>, vector<16x128xf32>,
    return
  }
  func.func @transform_0(%arg0: i32) -> (i32, i32) {
    %c0_i32 = arith.constant 0 : i32
    %c0_i32_0 = arith.constant 0 : i32
    return %arg0, %c0_i32 : i32, i32
  }
  func.func @transform_1(%arg0: i32) -> (i32, i32) {
    %c0_i32 = arith.constant 0 : i32
    %c0_i32_0 = arith.constant 0 : i32
    return %arg0, %c0_i32 : i32, i32
  }
  func.func @transform_2(%arg0: i32) -> (i32, i32) {
    %c0_i32 = arith.constant 0 : i32
    %c0_i32_0 = arith.constant 0 : i32
    %c0_i32_1 = arith.constant 0 : i32
    return %c0_i32, %c0_i32_0 : i32, i32
  }
  func.func @transform_3(%arg0: i32) -> (i32, i32) {
    %c0_i32 = arith.constant 0 : i32
    %c0_i32_0 = arith.constant 0 : i32
    %c0_i32_1 = arith.constant 0 : i32
    return %c0_i32, %c0_i32_0 : i32, i32
  }
  func.func @transform_4(%arg0: i32) -> (i32, i32) {
    %c0_i32 = arith.constant 0 : i32
    %c0_i32_0 = arith.constant 0 : i32
    %c0_i32_1 = arith.constant 0 : i32
    return %c0_i32, %c0_i32_0 : i32, i32
  }
  func.func @transform_5(%arg0: i32) -> (i32, i32) {
    %c0_i32 = arith.constant 0 : i32
    %c0_i32_0 = arith.constant 0 : i32
    return %arg0, %c0_i32 : i32, i32
  }
  func.func @transform_6(%arg0: i32) -> (i32, i32) {
    %c0_i32 = arith.constant 0 : i32
    %c0_i32_0 = arith.constant 0 : i32
    %c0_i32_1 = arith.constant 0 : i32
    return %c0_i32, %c0_i32_0 : i32, i32
  }
  func.func @transform_7(%arg0: i32) -> (i32, i32) {
    %c0_i32 = arith.constant 0 : i32
    %c0_i32_0 = arith.constant 0 : i32
    %c0_i32_1 = arith.constant 0 : i32
    return %c0_i32, %c0_i32_0 : i32, i32
  }
  func.func @transform_8(%arg0: i32) -> (i32, i32) {
    %c0_i32 = arith.constant 0 : i32
    %c0_i32_0 = arith.constant 0 : i32
    %c0_i32_1 = arith.constant 0 : i32
    return %c0_i32, %c0_i32_0 : i32, i32
  }
  func.func @transform_9(%arg0: i32) -> (i32, i32) {
    %c0_i32 = arith.constant 0 : i32
    %c0_i32_0 = arith.constant 0 : i32
    %c0_i32_1 = arith.constant 0 : i32
    return %c0_i32, %c0_i32_0 : i32, i32
  }
  func.func @transform_10(%arg0: i32) -> (i32, i32) {
    %c0_i32 = arith.constant 0 : i32
    %c0_i32_0 = arith.constant 0 : i32
    %c0_i32_1 = arith.constant 0 : i32
    return %c0_i32, %c0_i32_0 : i32, i32
  }
  func.func @transform_11(%arg0: i32) -> (i32, i32) {
    %c0_i32 = arith.constant 0 : i32
    %c0_i32_0 = arith.constant 0 : i32
    return %arg0, %c0_i32 : i32, i32
  }
}

module attributes {stable_mosaic.version = 11 : i64} {
  func.func @kernel(%arg0: i32, %arg1: memref<16x3xf32, #tpu.memory_space<vmem>>, %arg2: memref<16x1xi32, #tpu.memory_space<vmem>>, %arg3: memref<3x64xf32, #tpu.memory_space<vmem>>, %arg4: memref<1x64xi32, #tpu.memory_space<vmem>>, %arg5: memref<64x64xbf16, #tpu.memory_space<vmem>>, %arg6: memref<16x64xf32, #tpu.memory_space<vmem>>, %arg7: memref<64x128xbf16, #tpu.memory_space<vmem>>, %arg8: memref<64x128xbf16, #tpu.memory_space<vmem>>, %arg9: memref<1x128xf32, #tpu.memory_space<vmem>>, %arg10: memref<128x128xbf16, #tpu.memory_space<vmem>>, %arg11: memref<1x128xf32, #tpu.memory_space<vmem>>, %arg12: memref<16x128xf32, #tpu.memory_space<vmem>>) attributes {dimension_semantics = [#tpu.dimension_semantics<parallel>], iteration_bounds = array<i64: 8>, scalar_prefetch = 0 : i64, scratch_operands = 0 : i64, tpu.core_type = #tpu.core_type<tc>, window_params = [{transform_indices = @transform_0, window_bounds = array<i64: 16, 3>}, {transform_indices = @transform_1, window_bounds = array<i64: 16, 1>}, {pipeline_mode = #tpu.pipeline_mode<synchronous>, transform_indices = @transform_2, window_bounds = array<i64: 3, 64>}, {pipeline_mode = #tpu.pipeline_mode<synchronous>, transform_indices = @transform_3, window_bounds = array<i64: 1, 64>}, {pipeline_mode = #tpu.pipeline_mode<synchronous>, transform_indices = @transform_4, window_bounds = array<i64: 64, 64>}, {transform_indices = @transform_5, window_bounds = array<i64: 16, 64>}, {pipeline_mode = #tpu.pipeline_mode<synchronous>, transform_indices = @transform_6, window_bounds = array<i64: 64, 128>}, {pipeline_mode = #tpu.pipeline_mode<synchronous>, transform_indices = @transform_7, window_bounds = array<i64: 64, 128>}, {pipeline_mode = #tpu.pipeline_mode<synchronous>, transform_indices = @transform_8, window_bounds = array<i64: 1, 128>}, {pipeline_mode = #tpu.pipeline_mode<synchronous>, transform_indices = @transform_9, window_bounds = array<i64: 128, 128>}, {pipeline_mode = #tpu.pipeline_mode<synchronous>, transform_indices = @transform_10, window_bounds = array<i64: 1, 128>}, {transform_indices = @transform_11, window_bounds = array<i64: 16, 128>}]} {
    %c0 = arith.constant 0 : index
    %c0_0 = arith.constant 0 : index
    %0 = vector.load %arg1[%c0, %c0_0] : memref<16x3xf32, #tpu.memory_space<vmem>>, vector<16x3xf32>
    %c0_1 = arith.constant 0 : index
    %c0_2 = arith.constant 0 : index
    %1 = vector.load %arg3[%c0_1, %c0_2] : memref<3x64xf32, #tpu.memory_space<vmem>>, vector<3x64xf32>
    %cst = arith.constant 0.000000e+00 : f32
    %2 = vector.broadcast %cst : f32 to vector<16x64xf32>
    %3 = vector.extract_strided_slice %0 {offsets = [0, 0], sizes = [16, 1], strides = [1, 1]} : vector<16x3xf32> to vector<16x1xf32>
    %4 = vector.extract_strided_slice %1 {offsets = [0, 0], sizes = [1, 64], strides = [1, 1]} : vector<3x64xf32> to vector<1x64xf32>
    %5 = vector.broadcast %3 : vector<16x1xf32> to vector<16x64xf32>
    %6 = vector.broadcast %4 : vector<1x64xf32> to vector<16x64xf32>
    %7 = arith.subf %5, %6 : vector<16x64xf32>
    %8 = arith.mulf %7, %7 : vector<16x64xf32>
    %9 = arith.addf %2, %8 : vector<16x64xf32>
    %10 = vector.extract_strided_slice %0 {offsets = [0, 1], sizes = [16, 1], strides = [1, 1]} : vector<16x3xf32> to vector<16x1xf32>
    %11 = vector.extract_strided_slice %1 {offsets = [1, 0], sizes = [1, 64], strides = [1, 1]} : vector<3x64xf32> to vector<1x64xf32>
    %12 = vector.broadcast %10 : vector<16x1xf32> to vector<16x64xf32>
    %13 = vector.broadcast %11 : vector<1x64xf32> to vector<16x64xf32>
    %14 = arith.subf %12, %13 : vector<16x64xf32>
    %15 = arith.mulf %14, %14 : vector<16x64xf32>
    %16 = arith.addf %9, %15 : vector<16x64xf32>
    %17 = vector.extract_strided_slice %0 {offsets = [0, 2], sizes = [16, 1], strides = [1, 1]} : vector<16x3xf32> to vector<16x1xf32>
    %18 = vector.extract_strided_slice %1 {offsets = [2, 0], sizes = [1, 64], strides = [1, 1]} : vector<3x64xf32> to vector<1x64xf32>
    %19 = vector.broadcast %17 : vector<16x1xf32> to vector<16x64xf32>
    %20 = vector.broadcast %18 : vector<1x64xf32> to vector<16x64xf32>
    %21 = arith.subf %19, %20 : vector<16x64xf32>
    %22 = arith.mulf %21, %21 : vector<16x64xf32>
    %23 = arith.addf %16, %22 : vector<16x64xf32>
    %c0_3 = arith.constant 0 : index
    %c0_4 = arith.constant 0 : index
    %24 = vector.load %arg2[%c0_3, %c0_4] : memref<16x1xi32, #tpu.memory_space<vmem>>, vector<16x1xi32>
    %c0_5 = arith.constant 0 : index
    %c0_6 = arith.constant 0 : index
    %25 = vector.load %arg4[%c0_5, %c0_6] : memref<1x64xi32, #tpu.memory_space<vmem>>, vector<1x64xi32>
    %26 = vector.broadcast %24 : vector<16x1xi32> to vector<16x64xi32>
    %27 = vector.broadcast %25 : vector<1x64xi32> to vector<16x64xi32>
    %28 = arith.cmpi eq, %26, %27 : vector<16x64xi32>
    %cst_7 = arith.constant 0x7F800000 : f32
    %29 = vector.broadcast %cst_7 : f32 to vector<16x64xf32>
    %30 = arith.select %28, %23, %29 : vector<16x64xi1>, vector<16x64xf32>
    %31 = tpu.iota {dimensions = array<i32: 1>} : vector<16x64xi32>
    %cst_8 = arith.constant 0.000000e+00 : f32
    %32 = vector.broadcast %cst_8 : f32 to vector<16x64xf32>
    %cst_9 = arith.constant 0.000000e+00 : f32
    %33 = vector.broadcast %cst_9 : f32 to vector<16x1xf32>
    %cst_10 = arith.constant dense<0x7F800000> : vector<16xf32>
    %34 = vector.multi_reduction <minimumf>, %30, %cst_10 [1] : vector<16x64xf32> to vector<16xf32>
    %35 = vector.shape_cast %34 : vector<16xf32> to vector<16x1xf32>
    %36 = vector.broadcast %35 : vector<16x1xf32> to vector<16x64xf32>
    %37 = arith.cmpf oeq, %30, %36 : vector<16x64xf32>
    %c64_i32 = arith.constant 64 : i32
    %38 = vector.broadcast %c64_i32 : i32 to vector<16x64xi32>
    %39 = arith.select %37, %31, %38 : vector<16x64xi1>, vector<16x64xi32>
    %cst_11 = arith.constant dense<2147483647> : vector<16xi32>
    %40 = vector.multi_reduction <minsi>, %39, %cst_11 [1] : vector<16x64xi32> to vector<16xi32>
    %41 = vector.shape_cast %40 : vector<16xi32> to vector<16x1xi32>
    %42 = vector.broadcast %41 : vector<16x1xi32> to vector<16x64xi32>
    %43 = arith.cmpi eq, %31, %42 : vector<16x64xi32>
    %cst_12 = arith.constant 1.000000e-16 : f32
    %44 = vector.broadcast %cst_12 : f32 to vector<16x1xf32>
    %45 = arith.maximumf %35, %44 : vector<16x1xf32>
    %cst_13 = arith.constant 1.000000e+00 : f32
    %46 = vector.broadcast %cst_13 : f32 to vector<16x1xf32>
    %47 = arith.divf %46, %45 : vector<16x1xf32>
    %48 = vector.shape_cast %47 : vector<16x1xf32> to vector<16x1xf32>
    %49 = vector.broadcast %48 : vector<16x1xf32> to vector<16x64xf32>
    %50 = arith.select %43, %49, %32 : vector<16x64xi1>, vector<16x64xf32>
    %51 = arith.addf %33, %47 : vector<16x1xf32>
    %cst_14 = arith.constant 0x7F800000 : f32
    %52 = vector.broadcast %cst_14 : f32 to vector<16x64xf32>
    %53 = arith.select %43, %52, %30 : vector<16x64xi1>, vector<16x64xf32>
    %cst_15 = arith.constant dense<0x7F800000> : vector<16xf32>
    %54 = vector.multi_reduction <minimumf>, %53, %cst_15 [1] : vector<16x64xf32> to vector<16xf32>
    %55 = vector.shape_cast %54 : vector<16xf32> to vector<16x1xf32>
    %56 = vector.broadcast %55 : vector<16x1xf32> to vector<16x64xf32>
    %57 = arith.cmpf oeq, %53, %56 : vector<16x64xf32>
    %c64_i32_16 = arith.constant 64 : i32
    %58 = vector.broadcast %c64_i32_16 : i32 to vector<16x64xi32>
    %59 = arith.select %57, %31, %58 : vector<16x64xi1>, vector<16x64xi32>
    %cst_17 = arith.constant dense<2147483647> : vector<16xi32>
    %60 = vector.multi_reduction <minsi>, %59, %cst_17 [1] : vector<16x64xi32> to vector<16xi32>
    %61 = vector.shape_cast %60 : vector<16xi32> to vector<16x1xi32>
    %62 = vector.broadcast %61 : vector<16x1xi32> to vector<16x64xi32>
    %63 = arith.cmpi eq, %31, %62 : vector<16x64xi32>
    %cst_18 = arith.constant 1.000000e-16 : f32
    %64 = vector.broadcast %cst_18 : f32 to vector<16x1xf32>
    %65 = arith.maximumf %55, %64 : vector<16x1xf32>
    %cst_19 = arith.constant 1.000000e+00 : f32
    %66 = vector.broadcast %cst_19 : f32 to vector<16x1xf32>
    %67 = arith.divf %66, %65 : vector<16x1xf32>
    %68 = vector.shape_cast %67 : vector<16x1xf32> to vector<16x1xf32>
    %69 = vector.broadcast %68 : vector<16x1xf32> to vector<16x64xf32>
    %70 = arith.select %63, %69, %50 : vector<16x64xi1>, vector<16x64xf32>
    %71 = arith.addf %51, %67 : vector<16x1xf32>
    %cst_20 = arith.constant 0x7F800000 : f32
    %72 = vector.broadcast %cst_20 : f32 to vector<16x64xf32>
    %73 = arith.select %63, %72, %53 : vector<16x64xi1>, vector<16x64xf32>
    %cst_21 = arith.constant dense<0x7F800000> : vector<16xf32>
    %74 = vector.multi_reduction <minimumf>, %73, %cst_21 [1] : vector<16x64xf32> to vector<16xf32>
    %75 = vector.shape_cast %74 : vector<16xf32> to vector<16x1xf32>
    %76 = vector.broadcast %75 : vector<16x1xf32> to vector<16x64xf32>
    %77 = arith.cmpf oeq, %73, %76 : vector<16x64xf32>
    %c64_i32_22 = arith.constant 64 : i32
    %78 = vector.broadcast %c64_i32_22 : i32 to vector<16x64xi32>
    %79 = arith.select %77, %31, %78 : vector<16x64xi1>, vector<16x64xi32>
    %cst_23 = arith.constant dense<2147483647> : vector<16xi32>
    %80 = vector.multi_reduction <minsi>, %79, %cst_23 [1] : vector<16x64xi32> to vector<16xi32>
    %81 = vector.shape_cast %80 : vector<16xi32> to vector<16x1xi32>
    %82 = vector.broadcast %81 : vector<16x1xi32> to vector<16x64xi32>
    %83 = arith.cmpi eq, %31, %82 : vector<16x64xi32>
    %cst_24 = arith.constant 1.000000e-16 : f32
    %84 = vector.broadcast %cst_24 : f32 to vector<16x1xf32>
    %85 = arith.maximumf %75, %84 : vector<16x1xf32>
    %cst_25 = arith.constant 1.000000e+00 : f32
    %86 = vector.broadcast %cst_25 : f32 to vector<16x1xf32>
    %87 = arith.divf %86, %85 : vector<16x1xf32>
    %88 = vector.shape_cast %87 : vector<16x1xf32> to vector<16x1xf32>
    %89 = vector.broadcast %88 : vector<16x1xf32> to vector<16x64xf32>
    %90 = arith.select %83, %89, %70 : vector<16x64xi1>, vector<16x64xf32>
    %91 = arith.addf %71, %87 : vector<16x1xf32>
    %92 = arith.truncf %90 : vector<16x64xf32> to vector<16x64xbf16>
    %c0_26 = arith.constant 0 : index
    %c0_27 = arith.constant 0 : index
    %93 = vector.load %arg5[%c0_26, %c0_27] : memref<64x64xbf16, #tpu.memory_space<vmem>>, vector<64x64xbf16>
    %cst_28 = arith.constant dense<0.000000e+00> : vector<16x64xf32>
    %94 = tpu.matmul %92, %93, %cst_28 {dimension_numbers = #tpu.dot_dimension_numbers<[1], [0], [0], [1], [0, 0, 1, 1], [], []>} : vector<16x64xbf16>, vector<64x64xbf16>, vector<16x64xf32> -> vector<16x64xf32>
    %cst_29 = arith.constant 1.000000e-30 : f32
    %95 = vector.broadcast %cst_29 : f32 to vector<16x1xf32>
    %96 = arith.maximumf %91, %95 : vector<16x1xf32>
    %cst_30 = arith.constant 1.000000e+00 : f32
    %97 = vector.broadcast %cst_30 : f32 to vector<16x1xf32>
    %98 = arith.divf %97, %96 : vector<16x1xf32>
    %99 = vector.broadcast %98 : vector<16x1xf32> to vector<16x64xf32>
    %100 = arith.mulf %94, %99 : vector<16x64xf32>
    %101 = arith.truncf %100 : vector<16x64xf32> to vector<16x64xbf16>
    %c0_31 = arith.constant 0 : index
    %c0_32 = arith.constant 0 : index
    %102 = vector.load %arg7[%c0_31, %c0_32] : memref<64x128xbf16, #tpu.memory_space<vmem>>, vector<64x128xbf16>
    %cst_33 = arith.constant dense<0.000000e+00> : vector<16x128xf32>
    %103 = tpu.matmul %101, %102, %cst_33 {dimension_numbers = #tpu.dot_dimension_numbers<[1], [0], [0], [1], [0, 0, 1, 1], [], []>} : vector<16x64xbf16>, vector<64x128xbf16>, vector<16x128xf32> -> vector<16x128xf32>
    %c0_34 = arith.constant 0 : index
    %c0_35 = arith.constant 0 : index
    %104 = vector.load %arg6[%c0_34, %c0_35] : memref<16x64xf32, #tpu.memory_space<vmem>>, vector<16x64xf32>
    %105 = arith.truncf %104 : vector<16x64xf32> to vector<16x64xbf16>
    %c0_36 = arith.constant 0 : index
    %c0_37 = arith.constant 0 : index
    %106 = vector.load %arg8[%c0_36, %c0_37] : memref<64x128xbf16, #tpu.memory_space<vmem>>, vector<64x128xbf16>
    %cst_38 = arith.constant dense<0.000000e+00> : vector<16x128xf32>
    %107 = tpu.matmul %105, %106, %cst_38 {dimension_numbers = #tpu.dot_dimension_numbers<[1], [0], [0], [1], [0, 0, 1, 1], [], []>} : vector<16x64xbf16>, vector<64x128xbf16>, vector<16x128xf32> -> vector<16x128xf32>
    %108 = arith.addf %103, %107 : vector<16x128xf32>
    %c0_39 = arith.constant 0 : index
    %c0_40 = arith.constant 0 : index
    %109 = vector.load %arg9[%c0_39, %c0_40] : memref<1x128xf32, #tpu.memory_space<vmem>>, vector<1x128xf32>
    %110 = vector.broadcast %109 : vector<1x128xf32> to vector<16x128xf32>
    %111 = arith.addf %108, %110 : vector<16x128xf32>
    %cst_41 = arith.constant 0.000000e+00 : f32
    %112 = vector.broadcast %cst_41 : f32 to vector<16x128xf32>
    %113 = arith.maximumf %111, %112 : vector<16x128xf32>
    %114 = arith.truncf %113 : vector<16x128xf32> to vector<16x128xbf16>
    %c0_42 = arith.constant 0 : index
    %c0_43 = arith.constant 0 : index
    %115 = vector.load %arg10[%c0_42, %c0_43] : memref<128x128xbf16, #tpu.memory_space<vmem>>, vector<128x128xbf16>
    %cst_44 = arith.constant dense<0.000000e+00> : vector<16x128xf32>
    %116 = tpu.matmul %114, %115, %cst_44 {dimension_numbers = #tpu.dot_dimension_numbers<[1], [0], [0], [1], [0, 0, 1, 1], [], []>} : vector<16x128xbf16>, vector<128x128xbf16>, vector<16x128xf32> -> vector<16x128xf32>
    %c0_45 = arith.constant 0 : index
    %c0_46 = arith.constant 0 : index
    %117 = vector.load %arg11[%c0_45, %c0_46] : memref<1x128xf32, #tpu.memory_space<vmem>>, vector<1x128xf32>
    %118 = vector.broadcast %117 : vector<1x128xf32> to vector<16x128xf32>
    %119 = arith.addf %116, %118 : vector<16x128xf32>
    %cst_47 = arith.constant 0.000000e+00 : f32
    %120 = vector.broadcast %cst_47 : f32 to vector<16x128xf32>
    %121 = arith.maximumf %119, %120 : vector<16x128xf32>
    %c0_48 = arith.constant 0 : index
    %c0_49 = arith.constant 0 : index
    %122 = vector.load %arg12[%c0_48, %c0_49] : memref<16x128xf32, #tpu.memory_space<vmem>>, vector<16x128xf32>
    tpu.vector_store %arg12[%c0_48, %c0_49], %121 {strides = array<i32>} : memref<16x128xf32, #tpu.memory_space<vmem>>, vector<16x128xf32>,
    return
  }
  func.func @transform_0(%arg0: i32) -> (i32, i32) {
    %c0_i32 = arith.constant 0 : i32
    %c0_i32_0 = arith.constant 0 : i32
    return %arg0, %c0_i32 : i32, i32
  }
  func.func @transform_1(%arg0: i32) -> (i32, i32) {
    %c0_i32 = arith.constant 0 : i32
    %c0_i32_0 = arith.constant 0 : i32
    return %arg0, %c0_i32 : i32, i32
  }
  func.func @transform_2(%arg0: i32) -> (i32, i32) {
    %c0_i32 = arith.constant 0 : i32
    %c0_i32_0 = arith.constant 0 : i32
    %c0_i32_1 = arith.constant 0 : i32
    return %c0_i32, %c0_i32_0 : i32, i32
  }
  func.func @transform_3(%arg0: i32) -> (i32, i32) {
    %c0_i32 = arith.constant 0 : i32
    %c0_i32_0 = arith.constant 0 : i32
    %c0_i32_1 = arith.constant 0 : i32
    return %c0_i32, %c0_i32_0 : i32, i32
  }
  func.func @transform_4(%arg0: i32) -> (i32, i32) {
    %c0_i32 = arith.constant 0 : i32
    %c0_i32_0 = arith.constant 0 : i32
    %c0_i32_1 = arith.constant 0 : i32
    return %c0_i32, %c0_i32_0 : i32, i32
  }
  func.func @transform_5(%arg0: i32) -> (i32, i32) {
    %c0_i32 = arith.constant 0 : i32
    %c0_i32_0 = arith.constant 0 : i32
    return %arg0, %c0_i32 : i32, i32
  }
  func.func @transform_6(%arg0: i32) -> (i32, i32) {
    %c0_i32 = arith.constant 0 : i32
    %c0_i32_0 = arith.constant 0 : i32
    %c0_i32_1 = arith.constant 0 : i32
    return %c0_i32, %c0_i32_0 : i32, i32
  }
  func.func @transform_7(%arg0: i32) -> (i32, i32) {
    %c0_i32 = arith.constant 0 : i32
    %c0_i32_0 = arith.constant 0 : i32
    %c0_i32_1 = arith.constant 0 : i32
    return %c0_i32, %c0_i32_0 : i32, i32
  }
  func.func @transform_8(%arg0: i32) -> (i32, i32) {
    %c0_i32 = arith.constant 0 : i32
    %c0_i32_0 = arith.constant 0 : i32
    %c0_i32_1 = arith.constant 0 : i32
    return %c0_i32, %c0_i32_0 : i32, i32
  }
  func.func @transform_9(%arg0: i32) -> (i32, i32) {
    %c0_i32 = arith.constant 0 : i32
    %c0_i32_0 = arith.constant 0 : i32
    %c0_i32_1 = arith.constant 0 : i32
    return %c0_i32, %c0_i32_0 : i32, i32
  }
  func.func @transform_10(%arg0: i32) -> (i32, i32) {
    %c0_i32 = arith.constant 0 : i32
    %c0_i32_0 = arith.constant 0 : i32
    %c0_i32_1 = arith.constant 0 : i32
    return %c0_i32, %c0_i32_0 : i32, i32
  }
  func.func @transform_11(%arg0: i32) -> (i32, i32) {
    %c0_i32 = arith.constant 0 : i32
    %c0_i32_0 = arith.constant 0 : i32
    return %arg0, %c0_i32 : i32, i32
  }
}

</mosaic_0001>

<bundles_post_ra>
// kernel: fp_module_forward.1
= control target key start
LH: loop header
LB: loop body
LE: loop exit
PB: predicated region body
PF: predicated region fallthrough
CT: control target
= control target key end

     0   :  { %s1765_s0 = inlined_call_operand.vmem [shape: f32[128,3], index: 0, kind: input, shape index: {}]   ;;  %s1766_s1 = inlined_call_operand.vmem [shape: s32[128,1], index: 1, kind: input, shape index: {}]   ;;  %s1767_s2 = inlined_call_operand.vmem [shape: f32[3,64], index: 2, kind: input, shape index: {}]   ;;  %s1768_s3 = inlined_call_operand.vmem [shape: s32[1,64], index: 3, kind: input, shape index: {}]   ;;  %s1769_s4 = inlined_call_operand.vmem [shape: bf16[64,64], index: 4, kind: input, shape index: {}]   ;;  %s1770_s5 = inlined_call_operand.vmem [shape: f32[128,64], index: 5, kind: input, shape index: {}]   ;;  %s1771_s6 = inlined_call_operand.vmem [shape: bf16[64,128], index: 6, kind: input, shape index: {}]   ;;  %s1772_s7 = inlined_call_operand.vmem [shape: bf16[64,128], index: 7, kind: input, shape index: {}]   ;;  %s1773_s8 = inlined_call_operand.vmem [shape: f32[1,128], index: 8, kind: input, shape index: {}]   ;;  %s1774_s9 = inlined_call_operand.vmem [shape: bf16[128,128], index: 9, kind: input, shape index: {}]   ;;  %s1775_s10 = inlined_call_operand.vmem [shape: f32[1,128], index: 10, kind: input, shape index: {}]   ;;  %s1776_s11 = inlined_call_operand.hbm [shape: f32[128,128], index: 11, kind: output, shape index: {}]  }
   0x1   :  { %1777 = sst [smem:[#allocation5_spill]] %s1765_s0 }
   0x2   :  { %1778 = sst [smem:[#allocation6_spill]] %s1766_s1 }
   0x3   :  { %16 = vsyncpa [#allocation3], 0 }
   0x4   :  { %18 = vsyncpa [#allocation3 + $0x1], 0  ;;  %s1437_s17 = smov 0   ;;  %s1439_s18 = smov 0  }
   0x5   :  { %s1441_s19 = smov 0   ;;  %s1443_s20 = smov 0  }
   0x6 LB: > { %s1458_s21 = sadd.s32 4294967295, %s1370_s20   ;;  %s1121_s22 = sadd.s32 4294967294, %s1370_s20   ;;  %s1370_s20 = sphi %s1443_s20, %s1798_s20   ;;  %s1366_s19 = sphi %s1441_s19, %s1797_s19   ;;  %s1362_s18 = sphi %s1439_s18, %s1796_s18   ;;  %s1358_s17 = sphi %s1437_s17, %s1795_s17  }
   0x7   : > { %s1462_s23 = sadd.s32 1, %s1370_s20   ;;  %s277_s24 = sadd.s32 1, %s1366_s19 }
   0x8   : > { %s274_s25 = ssub.s32 %s1370_s20, %s1462_s23  ;;  %p287_p0 = scmp.ne.s32.totalorder %s1366_s19, %s1362_s18 }
   0x9   : > { %p275_p1 = scmp.eq.s32.totalorder %s274_s25, 0  ;;  %p288_p2 = scmp.eq.s32.totalorder %s1458_s21, 7 }
   0xa   : > { %p293_p3 = scmp.ne.s32.totalorder %s1362_s18, %s1358_s17  ;;  %p294_p4 = scmp.eq.s32.totalorder %s1121_s22, 7 }
   0xb   : > { %s1473_s26 = scalar_select %p275_p1, %s1366_s19, %s277_s24  }
   0xc   : > { %p1475_p5 = por %p288_p2, %p287_p0  ;;  %p1479_p6 = por %p294_p4, %p293_p3 }
   0xd   : > { %p1124_p7 = scmp.ge.s32.totalorder %s1370_s20, 1  ;;  %p363_p8 = scmp.lt.s32.totalorder %s1370_s20, 9 }
   0xf   : > { %p364_p9 = pnand %p1124_p7, %p363_p8 }
  0x10   : > { %s1126_s29 = sshll.u32 (!%p364_p9), %s1458_s21, 1  ;;  %s1781_s0 = sld [smem:[#allocation5_spill]] (!%p364_p9) }
  0x11   : > { %367 = sbr.rel (%p364_p9) target bundleno = 1688 (0x698), region = 64  ;;  %p414_p10 = scmp.lt.s32.totalorder (!%p364_p9), %s1126_s29, 15 }
  0x12   : > { %s1782_s1 = sld [smem:[#allocation6_spill]] (!%p364_p9) }
  0x16   : > { %v1372_v0 = vmov 1   ;;  %v1373_v1 = vmov 0   ;;  %v1374_v2 = vmov 2   ;;  %s1800_s29 = smov (!%p414_p10, %s1126_s29), 15  ;;  %v435_v7 = vld [vmem:[%s1767_s2] sm:$0x7]  ;;  %v497_v40 = vlaneseq }
  0x17   : > { %1286 = vset.pattern.permute.xlu1 %v1372_v0  ;;  %1285 = vset.pattern.permute.xlu0 %v1373_v1  ;;  %s1486_s30 = sshll.u32 %s1800_s29, 3  ;;  %v461_v9 = vperm.slane %v435_v7, 1  ;;  %v446_v11 = vperm.slane %v435_v7, 0  ;;  %v476_v13 = vperm.slane %v435_v7, 2  ;;  %v1289_v30 = vld [vmem:[%s1768_s3] ss:$0 sm:$0xff] }
  0x18   : > { %1287 = vset.pattern.permute.xlu2 %v1374_v2  ;;  %s417_s14 = scalar_lea.vmem %s1781_s0, %s1486_s30  ;;  %s423_s22 = scalar_lea.vmem %s1782_s1, %s1486_s30  ;;  %vm499_vm0 = vcmask 523264   ;;  %v1504_v41 = vand.u32 127, %v497_v40 }
  0x19   : > { %v433_v3 = vld [vmem:[%s417_s14] sm:$0xff]  ;;  %v434_v4 = vld [vmem:[%s417_s14 + $0x8] sm:$0xff]  ;;  %s410_s29 = sand.u32 1, %s1362_s18  }
  0x1a   : > { %454 = vperm.xlu1 %1286, %v433_v3   ;;  %438 = vperm.xlu0 %1285, %v433_v3   ;;  %v483_v5 = vld [vmem:[%s423_s22] sm:$0xff]  ;;  %v484_v6 = vld [vmem:[%s423_s22 + $0x8] sm:$0xff]  ;;  %s429_s22 = scalar_lea.vmem %s1770_s5, %s1486_s30  ;;  %s1125_s14 = sshll.u32 %s410_s29, 4 }
  0x1b   : > { %469 = vperm.xlu2 %1287, %v433_v3   ;;  %s1240_s30 = sshll.u32 %s1458_s21, 4  ;;  %s412_s15 = scalar_lea.vmem [#allocation2], %s1125_s14 }
  0x1c   : > { %s1031_s24 = scalar_lea.hbm %s1776_s11, %s1240_s30  ;;  %s1032_s25 = sshll.u32 %s412_s15, 4  ;;  %s1033_s25 = int_to_ptr.vmem [resolvable:$true] %s1032_s25 }
  0x1d   : > { %s1034_s0 = sshll.u32 %s1031_s24, 4  ;;  %s1020_s12 = scalar_lea.sflag [#allocation3], %s410_s29  ;;  %s1035_s0 = int_to_ptr.hbm [resolvable:$true] %s1034_s0 }
  0x1e   : > { %s1322_s13 = sshra.s32 %s1035_s0, 4  ;;  %s1328_s30 = scalar_lea.hbm %s1776_s11, 128  ;;  %s1323_s13 = int_to_ptr.hbm [resolvable:$true] %s1322_s13 }
  0x1f   : > { %s1324_s21 = scalar_lea.hbm %s1323_s13, 16  ;;  %p1329_p0 = scmp.lt.s32.totalorder %s1323_s13, %s1776_s11 }
  0x20   : > { %p1325_p11 = scmp.ne.s32.totalorder %s1323_s13, %s1324_s21  ;;  %p1330_p1 = scmp.lt.s32.totalorder %s1328_s30, %s1324_s21 }
  0x22   : > { %458 = vperm.xlu1 %1286, %v434_v4   ;;  %443 = vperm.xlu0 %1285, %v434_v4   ;;  %p1326_p12 = pnand %p1325_p11, %p1475_p5  ;;  %p1331_p2 = por %p1330_p1, %p1329_p0 }
  0x23   : > { %473 = vperm.xlu2 %1287, %v434_v4  }
  0x24   : > { %p1327_p13 = pneg %p1326_p12 }
  0x26   : > { %p1332_p3 = pnand %p1331_p2, %p1327_p13 }
  0x2a   : > { %1288 = vset.pattern.permute.xlu1 %v1373_v1  ;;  %487 = vperm.xlu0 %1285, %v483_v5  }
  0x2b   : > { %490 = vperm.xlu1 %1288, %v484_v6  }
  0x75   : > { %v470_v8 = vpop.permute.xlu2 %469 }
  0x76   : > { %v477_v17 = vsub.f32 %v470_v8, %v476_v13 }
  0x78   : > { %v479_v27 = vmul.f32 %v477_v17, %v477_v17 }
  0x7d   : > { %v474_v16 = vpop.permute.xlu2 %473 }
  0x7e   : > { %v478_v24 = vsub.f32 %v474_v16, %v476_v13 }
  0x80   : > { %v480_v31 = vmul.f32 %v478_v24, %v478_v24 }
  0x8c   : > { %v455_v10 = vpop.permute.xlu1 %454  ;;  %v439_v12 = vpop.permute.xlu0 %438 }
  0x8d   : > { %v462_v14 = vsub.f32 %v455_v10, %v461_v9  ;;  %v447_v15 = vsub.f32 %v439_v12, %v446_v11 }
  0x8f   : > { %v464_v18 = vmul.f32 %v462_v14, %v462_v14  ;;  %v449_v19 = vmul.f32 %v447_v15, %v447_v15 }
  0x91   : > { %v466_v28 = vadd.f32 %v464_v18, %v449_v19 }
  0x93   : > { %v481_v32 = vadd.f32 %v479_v27, %v466_v28 }
  0x94   : > { %v459_v20 = vpop.permute.xlu1 %458  ;;  %v444_v21 = vpop.permute.xlu0 %443 }
  0x95   : > { %v463_v22 = vsub.f32 %v459_v20, %v461_v9  ;;  %v448_v23 = vsub.f32 %v444_v21, %v446_v11 }
  0x97   : > { %v465_v25 = vmul.f32 %v463_v22, %v463_v22  ;;  %v450_v26 = vmul.f32 %v448_v23, %v448_v23 }
  0x99   : > { %v467_v29 = vadd.f32 %v465_v25, %v450_v26 }
  0x9b   : > { %v482_v35 = vadd.f32 %v480_v31, %v467_v29 }
  0x9c   : > { %v488_v33 = vpop.permute.xlu0 %487 }
  0x9d   : > { %vm493_vm1 = vcmp.eq.s32.totalorder %v488_v33, %v1289_v30  ;;  %v491_v34 = vpop.permute.xlu1 %490 }
  0x9e   : > { %v495_v36 = vsel %vm493_vm1, %v481_v32, inf  ;;  %vm494_vm2 = vcmp.eq.s32.totalorder %v491_v34, %v1289_v30 }
  0x9f   : > { %v496_v37 = vsel %vm494_vm2, %v482_v35, inf  ;;  %v500_v38 = vsel %vm499_vm0, %v495_v36, inf }
  0xa0   : > { %501 = vmin.xlane.f32.xlu2 %v500_v38  ;;  %v503_v39 = vsel %vm499_vm0, %v496_v37, inf }
  0xa1   : > { %504 = vmin.xlane.f32.xlu0 %v503_v39 }
 0x113   : > { %v1506_v42 = vpop.xlane.xlu2 %501 }
 0x114   : > { %vm506_vm3 = vcmp.eq.f32.partialorder %v495_v36, %v1506_v42  ;;  %v1509_v43 = vpop.xlane.xlu0 %504  ;;  %v542_v28 = vmax.f32 %v1506_v42, 1e-16 }
 0x115   : > { %v508_v44 = vsel %vm506_vm3, %v1504_v41, 64  ;;  %vm507_vm4 = vcmp.eq.f32.partialorder %v496_v37, %v1509_v43  ;;  %v543_v29 = vmax.f32 %v1509_v43, 1e-16 }
 0x116   : > { %v509_v45 = vsel %vm507_vm4, %v1504_v41, 64  ;;  %v510_v46 = vsel %vm499_vm0, %v508_v44, 2147483647  ;;  %1292 = vrcp.f32 %v542_v28  ;;  %vm549_vm14 = vweird.f32 %v542_v28 }
 0x117   : > { %v512_v47 = vshra.s32 %v510_v46, 16  ;;  %v525_v48 = vsel %vm499_vm0, %v509_v45, 2147483647  ;;  %v511_v52 = vand.u32 65535, %v510_v46  ;;  %1294 = vrcp.f32 %v543_v29 }
 0x118   : > { %v527_v49 = vshra.s32 %v525_v48, 16  ;;  %v526_v53 = vand.u32 65535, %v525_v48  ;;  %v555_v48 = vand.u32 2147483648, %v542_v28  ;;  %vm564_vm15 = vweird.f32 %v543_v29 }
 0x119   : > { %v514_v50 = vcvt.s32.f32 %v512_v47  ;;  %v513_v55 = vcvt.s32.f32 %v511_v52  ;;  %v553_v47 = vand.u32 2147483647, %v542_v28 }
 0x11a   : > { %v529_v51 = vcvt.s32.f32 %v527_v49  ;;  %v528_v57 = vcvt.s32.f32 %v526_v53  ;;  %v568_v49 = vand.u32 2147483647, %v543_v29 }
 0x11b   : > { %515 = vmin.xlane.f32.xlu1 %v514_v50  ;;  %vm1568_vm2 = vcmp.eq.f32.partialorder %v553_v47, 8.507059e+37 }
 0x11c   : > { %530 = vmin.xlane.f32.xlu2 %v529_v51  ;;  %v1293_v32 = vpop.eup %1292  ;;  %vm1572_vm3 = vcmp.eq.f32.partialorder %v568_v49, 8.507059e+37 }
 0x11d   : > { %v1295_v33 = vpop.eup %1294  ;;  %v545_v35 = vmul.f32 %v1293_v32, %v542_v28  ;;  %vm550_vm13 = vweird.f32 %v1293_v32 }
 0x11e   : > { %vm565_vm1 = vweird.f32 %v1295_v33  ;;  %vm1577_vm4 = vmor %vm549_vm14, %vm550_vm13 }
 0x11f   : > { %v546_v39 = vsub.f32 1.0, %v545_v35 }
 0x121   : > { %v547_v44 = vmul.f32 %v1293_v32, %v546_v39 }
 0x123   : > { %v548_v52 = vadd.f32 %v1293_v32, %v547_v44  ;;  %v1223_v44 = vld [vmem:[%s1769_s4 + $0x18] sm:$0xff] }
 0x124   : > { %778 = vmatpush.bf16.msra.mxu0 %v1223_v44  ;;  %v1239_v44 = vld [vmem:[%s1774_s9 + $0x38] sm:$0xff] }
 0x125   : > { %1001 = vmatpush.bf16.msra.mxu3 %v1239_v44 }
 0x18e   : > { %v516_v54 = vpop.xlane.xlu1 %515 }
 0x18f   : > { %v531_v56 = vpop.xlane.xlu2 %530  ;;  %vm517_vm5 = vcmp.eq.f32.partialorder %v514_v50, %v516_v54  ;;  %v522_v60 = vcvt.f32.s32 %v516_v54  ;;  %v570_v50 = vand.u32 2147483648, %v543_v29 }
 0x190   : > { %v518_v58 = vsel %vm517_vm5, %v513_v55, inf  ;;  %vm532_vm6 = vcmp.eq.f32.partialorder %v529_v51, %v531_v56  ;;  %v537_v61 = vcvt.f32.s32 %v531_v56  ;;  %v556_v56 = vor.u32 1.1754944e-38, %v555_v48  ;;  %v1221_v55 = vld [vmem:[%s1769_s4 + $0x8] sm:$0xff] }
 0x191   : > { %519 = vmin.xlane.f32.xlu2 %v518_v58  ;;  %v533_v59 = vsel %vm532_vm6, %v528_v57, inf  ;;  %v523_v63 = vshll.u32 %v522_v60, 16  ;;  %v571_v60 = vor.u32 1.1754944e-38, %v570_v50  ;;  %vm1586_vm6 = vmor %vm564_vm15, %vm565_vm1  ;;  %v1220_v57 = vld [vmem:[%s1769_s4] sm:$0xff] }
 0x192   : > { %534 = vmin.xlane.f32.xlu0 %v533_v59  ;;  %v538_v2 = vshll.u32 %v537_v61, 16  ;;  %v1227_v59 = vld [vmem:[%s1771_s6 + $0x18] sm:$0xff] }
 0x193   : > { %914 = vmatpush.bf16.msra.mxu2 %v1227_v59 }
 0x204   : > { %v520_v62 = vpop.xlane.xlu2 %519 }
 0x205   : > { %v521_v0 = vcvt.f32.s32 %v520_v62  ;;  %v535_v1 = vpop.xlane.xlu0 %534 }
 0x206   : > { %v536_v3 = vcvt.f32.s32 %v535_v1 }
 0x207   : > { %v1516_v4 = vadd.s32 %v523_v63, %v521_v0  ;;  %v552_v63 = vsel %vm1577_vm4, %v1293_v32, %v548_v52 }
 0x208   : > { %v1518_v5 = vadd.s32 %v538_v2, %v536_v3 }
 0x209   : > { %vm540_vm7 = vcmp.eq.s32.totalorder %v1504_v41, %v1516_v4 }
 0x20a   : > { %v1525_v6 = vsel %vm540_vm7, inf, %v495_v36  ;;  %vm541_vm8 = vcmp.eq.s32.totalorder %v1504_v41, %v1518_v5 }
 0x20b   : > { %v580_v7 = vsel %vm499_vm0, %v1525_v6, inf  ;;  %v1534_v8 = vsel %vm541_vm8, inf, %v496_v37  ;;  %v560_v37 = vmul.f32 %v1295_v33, %v543_v29 }
 0x20c   : > { %581 = vmin.xlane.f32.xlu1 %v580_v7  ;;  %v583_v9 = vsel %vm499_vm0, %v1534_v8, inf }
 0x20d   : > { %584 = vmin.xlane.f32.xlu2 %v583_v9  ;;  %v561_v42 = vsub.f32 1.0, %v560_v37 }
 0x20f   : > { %v562_v46 = vmul.f32 %v1295_v33, %v561_v42 }
 0x211   : > { %v563_v54 = vadd.f32 %v1295_v33, %v562_v46 }
 0x213   : > { %v567_v3 = vsel %vm1586_vm6, %v1295_v33, %v563_v54 }
 0x27f   : > { %v582_v10 = vpop.xlane.xlu1 %581 }
 0x280   : > { %vm586_vm9 = vcmp.eq.f32.partialorder %v1525_v6, %v582_v10  ;;  %v585_v11 = vpop.xlane.xlu2 %584  ;;  %v1552_v30 = vmax.f32 %v582_v10, 1e-16 }
 0x281   : > { %v588_v12 = vsel %vm586_vm9, %v1504_v41, 64  ;;  %vm587_vm10 = vcmp.eq.f32.partialorder %v1534_v8, %v585_v11  ;;  %v1554_v31 = vmax.f32 %v585_v11, 1e-16 }
 0x282   : > { %v589_v13 = vsel %vm587_vm10, %v1504_v41, 64  ;;  %v590_v14 = vsel %vm499_vm0, %v588_v12, 2147483647  ;;  %1296 = vrcp.f32 %v1552_v30  ;;  %v635_v1 = vand.u32 2147483648, %v1552_v30 }
 0x283   : > { %v592_v15 = vshra.s32 %v590_v14, 16  ;;  %v605_v16 = vsel %vm499_vm0, %v589_v13, 2147483647  ;;  %v591_v20 = vand.u32 65535, %v590_v14  ;;  %1298 = vrcp.f32 %v1554_v31 }
 0x284   : > { %v607_v17 = vshra.s32 %v605_v16, 16  ;;  %v606_v21 = vand.u32 65535, %v605_v16  ;;  %vm629_vm10 = vweird.f32 %v1552_v30  ;;  %v633_v9 = vand.u32 2147483647, %v1552_v30 }
 0x285   : > { %v594_v18 = vcvt.s32.f32 %v592_v15  ;;  %v593_v23 = vcvt.s32.f32 %v591_v20  ;;  %v650_v10 = vand.u32 2147483648, %v1554_v31  ;;  %v648_v15 = vand.u32 2147483647, %v1554_v31 }
 0x286   : > { %v609_v19 = vcvt.s32.f32 %v607_v17  ;;  %v608_v25 = vcvt.s32.f32 %v606_v21  ;;  %v1606_v16 = vsel %vm1568_vm2, %v556_v56, %v552_v63  ;;  %v1619_v21 = vsel %vm1572_vm3, %v571_v60, %v567_v3 }
 0x287   : > { %595 = vmin.xlane.f32.xlu0 %v594_v18  ;;  %vm634_vm14 = vcmp.eq.f32.partialorder %v633_v9, 8.507059e+37  ;;  %v575_v28 = vsel %vm541_vm8, %v1619_v21, 0.0  ;;  %vm649_vm1 = vcmp.eq.f32.partialorder %v648_v15, 8.507059e+37 }
 0x288   : > { %610 = vmin.xlane.f32.xlu1 %v609_v19  ;;  %v1558_v34 = vpop.eup %1296 }
 0x289   : > { %v1560_v36 = vpop.eup %1298  ;;  %v625_v38 = vmul.f32 %v1558_v34, %v1552_v30  ;;  %vm630_vm5 = vweird.f32 %v1558_v34 }
 0x28a   : > { %v640_v40 = vmul.f32 %v1560_v36, %v1554_v31  ;;  %vm645_vm9 = vweird.f32 %v1560_v36 }
 0x28b   : > { %v626_v43 = vsub.f32 1.0, %v625_v38 }
 0x28c   : > { %v641_v45 = vsub.f32 1.0, %v640_v40 }
 0x28d   : > { %v627_v51 = vmul.f32 %v1558_v34, %v626_v43 }
 0x28e   : > { %v642_v53 = vmul.f32 %v1560_v36, %v641_v45  ;;  %v1222_v45 = vld [vmem:[%s1769_s4 + $0x10] sm:$0xff] }
 0x28f   : > { %v628_v62 = vadd.f32 %v1558_v34, %v627_v51  ;;  %779 = vmatpush.bf16.msra.mxu0 %v1222_v45  ;;  %v1238_v45 = vld [vmem:[%s1774_s9 + $0x30] sm:$0xff] }
 0x290   : > { %v643_v2 = vadd.f32 %v1560_v36, %v642_v53  ;;  %1002 = vmatpush.bf16.msra.mxu3 %v1238_v45 }
 0x293   : > { %780 = vmatpush.bf16.msra.mxu0 %v1221_v55 }
 0x297   : > { %781 = vmatpush.bf16.msra.mxu0 %v1220_v57 }
 0x2fa   : > { %v1544_v22 = vpop.xlane.xlu0 %595 }
 0x2fb   : > { %v1546_v24 = vpop.xlane.xlu1 %610  ;;  %vm597_vm11 = vcmp.eq.f32.partialorder %v594_v18, %v1544_v22  ;;  %v602_v58 = vcvt.f32.s32 %v1544_v22 }
 0x2fc   : > { %v598_v26 = vsel %vm597_vm11, %v593_v23, inf  ;;  %vm612_vm12 = vcmp.eq.f32.partialorder %v609_v19, %v1546_v24  ;;  %v617_v61 = vcvt.f32.s32 %v1546_v24  ;;  %vm1598_vm11 = vmor %vm629_vm10, %vm630_vm5  ;;  %v636_v23 = vor.u32 1.1754944e-38, %v635_v1 }
 0x2fd   : > { %599 = vmin.xlane.f32.xlu2 %v598_v26  ;;  %v613_v27 = vsel %vm612_vm12, %v608_v25, inf  ;;  %v603_v11 = vshll.u32 %v602_v58, 16  ;;  %vm644_vm12 = vweird.f32 %v1554_v31  ;;  %v632_v19 = vsel %vm1598_vm11, %v1558_v34, %v628_v62  ;;  %v1231_v58 = vld [vmem:[%s1772_s7 + $0x18] sm:$0xff] }
 0x2fe   : > { %614 = vmin.xlane.f32.xlu0 %v613_v27  ;;  %v618_v17 = vshll.u32 %v617_v61, 16  ;;  %vm1613_vm13 = vmor %vm644_vm12, %vm645_vm9  ;;  %v574_v25 = vsel %vm540_vm7, %v1606_v16, 0.0  ;;  %v651_v27 = vor.u32 1.1754944e-38, %v650_v10  ;;  %v1633_v29 = vsel %vm634_vm14, %v636_v23, %v632_v19  ;;  %873 = vmatpush.bf16.msra.mxu1 %v1231_v58 }
 0x2ff   : > { %v647_v24 = vsel %vm1613_vm13, %v1560_v36, %v643_v2 }
 0x300   : > { %v1640_v4 = vsel %vm649_vm1, %v651_v27, %v647_v24 }
 0x370   : > { %v600_v7 = vpop.xlane.xlu2 %599 }
 0x371   : > { %v601_v12 = vcvt.f32.s32 %v600_v7  ;;  %v615_v13 = vpop.xlane.xlu0 %614 }
 0x372   : > { %v616_v18 = vcvt.f32.s32 %v615_v13 }
 0x373   : > { %v604_v22 = vadd.s32 %v603_v11, %v601_v12 }
 0x374   : > { %v619_v26 = vadd.s32 %v618_v17, %v616_v18 }
 0x375   : > { %vm620_vm15 = vcmp.eq.s32.totalorder %v1504_v41, %v604_v22 }
 0x376   : > { %v658_v30 = vsel %vm620_vm15, inf, %v1525_v6  ;;  %v1637_v31 = vsel %vm620_vm15, %v1633_v29, %v574_v25  ;;  %vm621_vm7 = vcmp.eq.s32.totalorder %v1504_v41, %v619_v26 }
 0x377   : > { %v660_v32 = vsel %vm499_vm0, %v658_v30, inf  ;;  %v659_v33 = vsel %vm621_vm7, inf, %v1534_v8  ;;  %v1645_v5 = vsel %vm621_vm7, %v1640_v4, %v575_v28 }
 0x378   : > { %661 = vmin.xlane.f32.xlu1 %v660_v32  ;;  %v663_v34 = vsel %vm499_vm0, %v659_v33, inf }
 0x379   : > { %664 = vmin.xlane.f32.xlu2 %v663_v34 }
 0x3eb   : > { %v662_v35 = vpop.xlane.xlu1 %661 }
 0x3ec   : > { %vm666_vm8 = vcmp.eq.f32.partialorder %v658_v30, %v662_v35  ;;  %v665_v6 = vpop.xlane.xlu2 %664  ;;  %v702_v54 = vmax.f32 %v662_v35, 1e-16 }
 0x3ed   : > { %v668_v36 = vsel %vm666_vm8, %v1504_v41, 64  ;;  %vm667_vm2 = vcmp.eq.f32.partialorder %v659_v33, %v665_v6  ;;  %v703_v56 = vmax.f32 %v665_v6, 1e-16 }
 0x3ee   : > { %v669_v37 = vsel %vm667_vm2, %v1504_v41, 64  ;;  %v670_v38 = vsel %vm499_vm0, %v668_v36, 2147483647  ;;  %1300 = vrcp.f32 %v702_v54  ;;  %v715_v11 = vand.u32 2147483648, %v702_v54 }
 0x3ef   : > { %v672_v39 = vshra.s32 %v670_v38, 16  ;;  %v685_v8 = vsel %vm499_vm0, %v669_v37, 2147483647  ;;  %v671_v46 = vand.u32 65535, %v670_v38  ;;  %1302 = vrcp.f32 %v703_v56  ;;  %v1230_v37 = vld [vmem:[%s1772_s7 + $0x10] sm:$0xff] }
 0x3f0   : > { %v687_v40 = vshra.s32 %v685_v8, 16  ;;  %v686_v47 = vand.u32 65535, %v685_v8  ;;  %vm709_vm9 = vweird.f32 %v702_v54  ;;  %v713_v14 = vand.u32 2147483647, %v702_v54  ;;  %874 = vmatpush.bf16.msra.mxu1 %v1230_v37 }
 0x3f1   : > { %v674_v42 = vcvt.s32.f32 %v672_v39  ;;  %v673_v49 = vcvt.s32.f32 %v671_v46  ;;  %v730_v15 = vand.u32 2147483648, %v703_v56  ;;  %vm724_vm11 = vweird.f32 %v703_v56 }
 0x3f2   : > { %v689_v43 = vcvt.s32.f32 %v687_v40  ;;  %v688_v51 = vcvt.s32.f32 %v686_v47  ;;  %v728_v20 = vand.u32 2147483647, %v703_v56  ;;  %v716_v26 = vor.u32 1.1754944e-38, %v715_v11  ;;  %v831_v40 = vld [vmem:[%s429_s22] sm:$0xff]  ;;  %v1237_v11 = vld [vmem:[%s1774_s9 + $0x28] sm:$0xff] }
 0x3f3   : > { %675 = vmin.xlane.f32.xlu0 %v674_v42  ;;  %vm714_vm13 = vcmp.eq.f32.partialorder %v713_v14, 8.507059e+37  ;;  %v731_v30 = vor.u32 1.1754944e-38, %v730_v15  ;;  %v656_v36 = vadd.f32 %v1633_v29, %v1606_v16  ;;  %v1225_v16 = vld [vmem:[%s1771_s6 + $0x8] sm:$0xff]  ;;  %1003 = vmatpush.bf16.msra.mxu3 %v1237_v11  ;;  %v1234_v14 = vld [vmem:[%s1774_s9 + $0x10] sm:$0xff] }
 0x3f4   : > { %690 = vmin.xlane.f32.xlu1 %v689_v43  ;;  %v1301_v60 = vpop.eup %1300  ;;  %vm729_vm15 = vcmp.eq.f32.partialorder %v728_v20, 8.507059e+37  ;;  %v1233_v15 = vld [vmem:[%s1774_s9 + $0x8] sm:$0xff] }
 0x3f5   : > { %v1303_v61 = vpop.eup %1302  ;;  %v705_v62 = vmul.f32 %v1301_v60, %v702_v54  ;;  %vm710_vm5 = vweird.f32 %v1301_v60 }
 0x3f6   : > { %v720_v63 = vmul.f32 %v1303_v61, %v703_v56  ;;  %vm725_vm6 = vweird.f32 %v1303_v61  ;;  %vm711_vm10 = vmor %vm709_vm9, %vm710_vm5 }
 0x3f7   : > { %v706_v0 = vsub.f32 1.0, %v705_v62  ;;  %vm726_vm12 = vmor %vm724_vm11, %vm725_vm6 }
 0x3f8   : > { %v721_v1 = vsub.f32 1.0, %v720_v63 }
 0x3f9   : > { %v707_v2 = vmul.f32 %v1301_v60, %v706_v0 }
 0x3fa   : > { %v722_v3 = vmul.f32 %v1303_v61, %v721_v1 }
 0x3fb   : > { %v708_v10 = vadd.f32 %v1301_v60, %v707_v2 }
 0x3fc   : > { %v723_v12 = vadd.f32 %v1303_v61, %v722_v3 }
 0x3fd   : > { %v712_v24 = vsel %vm711_vm10, %v1301_v60, %v708_v10 }
 0x3fe   : > { %v727_v27 = vsel %vm726_vm12, %v1303_v61, %v723_v12  ;;  %v717_v32 = vsel %vm714_vm13, %v716_v26, %v712_v24  ;;  %v1236_v12 = vld [vmem:[%s1774_s9 + $0x20] sm:$0xff] }
 0x3ff   : > { %v732_v33 = vsel %vm729_vm15, %v731_v30, %v727_v27  ;;  %v736_v38 = vadd.f32 %v717_v32, %v656_v36  ;;  %1004 = vmatpush.bf16.msra.mxu3 %v1236_v12 }
 0x401   : > { %v788_v39 = vmax.f32 %v736_v38, 1e-30 }
 0x403   : > { %1304 = vrcp.f32 %v788_v39  ;;  %vm795_vm2 = vweird.f32 %v788_v39  ;;  %v801_v57 = vand.u32 2147483648, %v788_v39  ;;  %v799_v59 = vand.u32 2147483647, %v788_v39 }
 0x405   : > { %v802_v63 = vor.u32 1.1754944e-38, %v801_v57  ;;  %vm800_vm6 = vcmp.eq.f32.partialorder %v799_v59, 8.507059e+37 }
 0x409   : > { %v1305_v46 = vpop.eup %1304 }
 0x40a   : > { %vm796_vm7 = vweird.f32 %v1305_v46 }
 0x466   : > { %v676_v48 = vpop.xlane.xlu0 %675 }
 0x467   : > { %v691_v50 = vpop.xlane.xlu1 %690  ;;  %vm677_vm3 = vcmp.eq.f32.partialorder %v674_v42, %v676_v48  ;;  %v682_v7 = vcvt.f32.s32 %v676_v48  ;;  %v832_v42 = vld [vmem:[%s429_s22 + $0x8] sm:$0xff]  ;;  %v791_v48 = vmul.f32 %v1305_v46, %v788_v39 }
 0x468   : > { %vm692_vm4 = vcmp.eq.f32.partialorder %v689_v43, %v691_v50  ;;  %v678_v52 = vsel %vm677_vm3, %v673_v49, inf  ;;  %v697_v9 = vcvt.f32.s32 %v691_v50  ;;  %v833_v43 = vpack.c.bf16 %v832_v42, %v831_v40  ;;  %vm797_vm3 = vmor %vm795_vm2, %vm796_vm7 }
 0x469   : > { %679 = vmin.xlane.f32.xlu2 %v678_v52  ;;  %v693_v53 = vsel %vm692_vm4, %v688_v51, inf  ;;  %v683_v17 = vshll.u32 %v682_v7, 16  ;;  %v792_v50 = vsub.f32 1.0, %v791_v48 }
 0x46a   : > { %694 = vmin.xlane.f32.xlu0 %v693_v53  ;;  %v698_v22 = vshll.u32 %v697_v9, 16 }
 0x46b   : > { %v793_v52 = vmul.f32 %v1305_v46, %v792_v50 }
 0x46d   : > { %v794_v55 = vadd.f32 %v1305_v46, %v793_v52 }
 0x46f   : > { %v798_v61 = vsel %vm797_vm3, %v1305_v46, %v794_v55 }
 0x470   : > { %v803_v1 = vsel %vm800_vm6, %v802_v63, %v798_v61 }
 0x4dc   : > { %v680_v13 = vpop.xlane.xlu2 %679 }
 0x4dd   : > { %v681_v18 = vcvt.f32.s32 %v680_v13  ;;  %v695_v19 = vpop.xlane.xlu0 %694  ;;  %v1235_v13 = vld [vmem:[%s1774_s9 + $0x18] sm:$0xff] }
 0x4de   : > { %v696_v23 = vcvt.f32.s32 %v695_v19  ;;  %1005 = vmatpush.bf16.msra.mxu3 %v1235_v13 }
 0x4df   : > { %v684_v25 = vadd.s32 %v683_v17, %v681_v18  ;;  %v1232_v17 = vld [vmem:[%s1774_s9] sm:$0xff] }
 0x4e0   : > { %v699_v28 = vadd.s32 %v698_v22, %v696_v23  ;;  %v1290_v22 = vld [vmem:[%s1773_s8] ss:$0 sm:$0xff] }
 0x4e1   : > { %vm700_vm14 = vcmp.eq.s32.totalorder %v1504_v41, %v684_v25 }
 0x4e2   : > { %vm701_vm1 = vcmp.eq.s32.totalorder %v1504_v41, %v699_v28  ;;  %v734_v34 = vsel %vm700_vm14, %v717_v32, %v1637_v31  ;;  %v1226_v41 = vld [vmem:[%s1771_s6 + $0x10] sm:$0xff]  ;;  %v657_v31 = vadd.f32 %v1640_v4, %v1619_v21  ;;  %v1228_v21 = vld [vmem:[%s1772_s7] sm:$0xff]  ;;  %1006 = vmatpush.bf16.msra.mxu3 %v1234_v14 }
 0x4e3   : > { %v735_v35 = vsel %vm701_vm1, %v732_v33, %v1645_v5  ;;  %915 = vmatpush.bf16.msra.mxu2 %v1226_v41  ;;  %v1229_v5 = vld [vmem:[%s1772_s7 + $0x8] sm:$0xff]  ;;  %v1224_v4 = vld [vmem:[%s1771_s6] sm:$0xff] }
 0x4e4   : > { %v738_v6 = vpack.c.bf16 %v735_v35, %v734_v34  ;;  %v737_v29 = vadd.f32 %v732_v33, %v657_v31  ;;  %875 = vmatpush.bf16.msra.mxu1 %v1229_v5  ;;  %v1291_v33 = vld [vmem:[%s1775_s10] ss:$0 sm:$0xff] }
 0x4e6   : > { %1148 = vmatmul.msk.bf16.vlgmr.msra.gmra.mxu0 %vm499_vm0, %v738_v6  ;;  %v789_v8 = vmax.f32 %v737_v29, 1e-30  ;;  %1007 = vmatpush.bf16.msra.mxu3 %v1233_v15 }
 0x4e7   : > { %916 = vmatpush.bf16.msra.mxu2 %v1225_v16 }
 0x4e8   : > { %1306 = vrcp.f32 %v789_v8  ;;  %876 = vmatpush.bf16.msra.mxu1 %v1228_v21  ;;  %v816_v58 = vand.u32 2147483648, %v789_v8  ;;  %vm810_vm4 = vweird.f32 %v789_v8  ;;  %v814_v60 = vand.u32 2147483647, %v789_v8 }
 0x4ea   : > { %v817_v0 = vor.u32 1.1754944e-38, %v816_v58  ;;  %vm815_vm9 = vcmp.eq.f32.partialorder %v814_v60, 8.507059e+37  ;;  %1008 = vmatpush.bf16.msra.mxu3 %v1232_v17 }
 0x4eb   : > { %917 = vmatpush.bf16.msra.mxu2 %v1224_v4  ;;  %1165 = vmatmul.msk.bf16.vlgmr.msra.gmra.mxu1 %vm499_vm0, %v833_v43 }
 0x4ee   : > { %v1307_v47 = vpop.eup %1306 }
 0x4ef   : > { %v806_v49 = vmul.f32 %v1307_v47, %v789_v8  ;;  %vm811_vm8 = vweird.f32 %v1307_v47 }
 0x4f0   : > { %vm812_vm5 = vmor %vm810_vm4, %vm811_vm8 }
 0x4f1   : > { %v807_v51 = vsub.f32 1.0, %v806_v49 }
 0x4f3   : > { %v808_v53 = vmul.f32 %v1307_v47, %v807_v51 }
 0x4f5   : > { %v809_v56 = vadd.f32 %v1307_v47, %v808_v53 }
 0x4f7   : > { %v813_v62 = vsel %vm812_vm5, %v1307_v47, %v809_v56 }
 0x4f8   : > { %v818_v3 = vsel %vm815_vm9, %v817_v0, %v813_v62 }
 0x563   : > { %v783_v54 = vpop.f32.mrf.mxu0 }
 0x564   : > { %v820_v7 = vmul.f32 %v803_v1, %v783_v54 }
 0x568   : > { %v878_v18 = vpop.f32.mrf.mxu1 }
 0x56b   : > { %v785_v2 = vpop.f32.mrf.mxu0 }
 0x56c   : > { %v821_v9 = vmul.f32 %v818_v3, %v785_v2 }
 0x56e   : > { %v822_v10 = vpack.c.bf16 %v821_v9, %v820_v7 }
 0x570   : > { %1182 = vmatmul.msk.bf16.vlgmr.msra.gmra.mxu2 %vm499_vm0, %v822_v10  ;;  %v880_v23 = vpop.f32.mrf.mxu1 }
 0x5f3   : > { %v919_v19 = vpop.f32.mrf.mxu2 }
 0x5f4   : > { %v920_v20 = vadd.f32 %v919_v19, %v878_v18 }
 0x5f6   : > { %v928_v25 = vadd.f32 %v1290_v22, %v920_v20 }
 0x5f8   : > { %v930_v28 = vmax.f32 %v928_v25, 0.0 }
 0x5fb   : > { %v921_v24 = vpop.f32.mrf.mxu2 }
 0x5fc   : > { %v922_v26 = vadd.f32 %v921_v24, %v880_v23 }
 0x5fe   : > { %v929_v27 = vadd.f32 %v1290_v22, %v922_v26 }
 0x600   : > { %v931_v30 = vmax.f32 %v929_v27, 0.0 }
 0x602   : > { %v932_v32 = vpack.c.bf16 %v931_v30, %v930_v28 }
 0x604   : > { %1009 = vmatmul.bf16.vlgmr.msra.gmra.mxu3 %v932_v32 }
 0x687   : > { %v1010_v34 = vpop.f32.mrf.mxu3 }
 0x688   : > { %v1011_v35 = vadd.f32 %v1291_v33, %v1010_v34 }
 0x68a   : > { %v1015_v6 = vmax.f32 %v1011_v35, 0.0 }
 0x68c   : > { %1017 = vst [vmem:[%s412_s15] sm:$0xff] %v1015_v6 }
 0x68f   : > { %v1012_v36 = vpop.f32.mrf.mxu3 }
 0x690   : > { %v1013_v37 = vadd.f32 %v1291_v33, %v1012_v36 }
 0x692   : > { %v1016_v41 = vmax.f32 %v1013_v37, 0.0 }
 0x694   : > { %1018 = vst [vmem:[%s412_s15 + $0x8] sm:$0xff] %v1016_v41 }
 0x695   : > { %1335 = shalt.err (!%p1332_p3)
}
 0x696   : > { %s1375_s29 = smov 128   ;;  %s1376_s15 = smov 8  }
 0x697   : > { %1241 = dma.vmem_to_hbm [thread:$0]  (%p1475_p5), %s1033_s25, 256, %s1035_s0, %s1020_s12, %s1375_s29, %s1375_s29, %s1376_s15  }
 0x698 PF: > { %p1247_p4 = scmp.ge.s32.totalorder %s1370_s20, 2  ;;  %s1049_s1 = sand.u32 1, %s1358_s17  }
 0x699   : > { %s1050_s24 = scalar_lea.sflag [#allocation3], %s1049_s1 }
 0x69a   : > { %p1244_p7 = pnand %p1247_p4, %p1479_p6 }
 0x69c   : > { %p1245_p8 = pneg %p1244_p7 }
 0x69e   : > { %1353 = dma.done.wait (%p1245_p8), %s1050_s24, 256  }
 0x69f   : > { %1355 = vsyncadd (%p1245_p8), %s1050_s24, 4294967040  ;;  %p21_p9 = scmp.ge.s32.totalorder %s1462_s23, 10   ;;  %s1795_s17 = smov %s1362_s18 }
 0x6a0   : > { %s1796_s18 = smov %s1366_s19  ;;  %s1797_s19 = smov %s1473_s26 }
 0x6a1   : > { %s1798_s20 = smov %s1462_s23  ;;  %23 = sbr.rel (!%p21_p9) target bundleno = 6 (0x6), region = 105 }
 0x6a6   :  { %1056 = vsyncpa [#allocation3], 1 }
 0x6a7   :  { %1058 = vsyncpa [#allocation3 + $0x1], 1 }

// kernel: fp_module_forward.1
= control target key start
LH: loop header
LB: loop body
LE: loop exit
PB: predicated region body
PF: predicated region fallthrough
CT: control target
= control target key end

     0   :  { %s1765_s0 = inlined_call_operand.vmem [shape: f32[128,3], index: 0, kind: input, shape index: {}]   ;;  %s1766_s1 = inlined_call_operand.vmem [shape: s32[128,1], index: 1, kind: input, shape index: {}]   ;;  %s1767_s2 = inlined_call_operand.vmem [shape: f32[3,64], index: 2, kind: input, shape index: {}]   ;;  %s1768_s3 = inlined_call_operand.vmem [shape: s32[1,64], index: 3, kind: input, shape index: {}]   ;;  %s1769_s4 = inlined_call_operand.vmem [shape: bf16[64,64], index: 4, kind: input, shape index: {}]   ;;  %s1770_s5 = inlined_call_operand.vmem [shape: f32[128,64], index: 5, kind: input, shape index: {}]   ;;  %s1771_s6 = inlined_call_operand.vmem [shape: bf16[64,128], index: 6, kind: input, shape index: {}]   ;;  %s1772_s7 = inlined_call_operand.vmem [shape: bf16[64,128], index: 7, kind: input, shape index: {}]   ;;  %s1773_s8 = inlined_call_operand.vmem [shape: f32[1,128], index: 8, kind: input, shape index: {}]   ;;  %s1774_s9 = inlined_call_operand.vmem [shape: bf16[128,128], index: 9, kind: input, shape index: {}]   ;;  %s1775_s10 = inlined_call_operand.vmem [shape: f32[1,128], index: 10, kind: input, shape index: {}]   ;;  %s1776_s11 = inlined_call_operand.hbm [shape: f32[128,128], index: 11, kind: output, shape index: {}]  }
   0x1   :  { %1777 = sst [smem:[#allocation5_spill]] %s1765_s0 }
   0x2   :  { %1778 = sst [smem:[#allocation6_spill]] %s1766_s1 }
   0x3   :  { %16 = vsyncpa [#allocation3], 0 }
   0x4   :  { %18 = vsyncpa [#allocation3 + $0x1], 0  ;;  %s1437_s17 = smov 0   ;;  %s1439_s18 = smov 0  }
   0x5   :  { %s1441_s19 = smov 0   ;;  %s1443_s20 = smov 0  }
   0x6 LB: > { %s1458_s21 = sadd.s32 4294967295, %s1370_s20   ;;  %s1121_s22 = sadd.s32 4294967294, %s1370_s20   ;;  %s1370_s20 = sphi %s1443_s20, %s1798_s20   ;;  %s1366_s19 = sphi %s1441_s19, %s1797_s19   ;;  %s1362_s18 = sphi %s1439_s18, %s1796_s18   ;;  %s1358_s17 = sphi %s1437_s17, %s1795_s17  }
   0x7   : > { %s1462_s23 = sadd.s32 1, %s1370_s20   ;;  %s277_s24 = sadd.s32 1, %s1366_s19 }
   0x8   : > { %s274_s25 = ssub.s32 %s1370_s20, %s1462_s23  ;;  %p287_p0 = scmp.ne.s32.totalorder %s1366_s19, %s1362_s18 }
   0x9   : > { %p275_p1 = scmp.eq.s32.totalorder %s274_s25, 0  ;;  %p288_p2 = scmp.eq.s32.totalorder %s1458_s21, 7 }
   0xa   : > { %p293_p3 = scmp.ne.s32.totalorder %s1362_s18, %s1358_s17  ;;  %p294_p4 = scmp.eq.s32.totalorder %s1121_s22, 7 }
   0xb   : > { %s1473_s26 = scalar_select %p275_p1, %s1366_s19, %s277_s24  }
   0xc   : > { %p1475_p5 = por %p288_p2, %p287_p0  ;;  %p1479_p6 = por %p294_p4, %p293_p3 }
   0xd   : > { %p1124_p7 = scmp.ge.s32.totalorder %s1370_s20, 1  ;;  %p363_p8 = scmp.lt.s32.totalorder %s1370_s20, 9 }
   0xf   : > { %p364_p9 = pnand %p1124_p7, %p363_p8 }
  0x10   : > { %s1126_s29 = sshll.u32 (!%p364_p9), %s1458_s21, 1  ;;  %s1781_s0 = sld [smem:[#allocation5_spill]] (!%p364_p9) }
  0x11   : > { %367 = sbr.rel (%p364_p9) target bundleno = 1688 (0x698), region = 64  ;;  %p414_p10 = scmp.lt.s32.totalorder (!%p364_p9), %s1126_s29, 15 }
  0x12   : > { %s1782_s1 = sld [smem:[#allocation6_spill]] (!%p364_p9) }
  0x16   : > { %v1372_v0 = vmov 1   ;;  %v1373_v1 = vmov 0   ;;  %v1374_v2 = vmov 2   ;;  %s1800_s29 = smov (!%p414_p10, %s1126_s29), 15  ;;  %v435_v7 = vld [vmem:[%s1767_s2] sm:$0x7]  ;;  %v497_v40 = vlaneseq }
  0x17   : > { %1286 = vset.pattern.permute.xlu1 %v1372_v0  ;;  %1285 = vset.pattern.permute.xlu0 %v1373_v1  ;;  %s1486_s30 = sshll.u32 %s1800_s29, 3  ;;  %v461_v9 = vperm.slane %v435_v7, 1  ;;  %v446_v11 = vperm.slane %v435_v7, 0  ;;  %v476_v13 = vperm.slane %v435_v7, 2  ;;  %v1289_v30 = vld [vmem:[%s1768_s3] ss:$0 sm:$0xff] }
  0x18   : > { %1287 = vset.pattern.permute.xlu2 %v1374_v2  ;;  %s417_s14 = scalar_lea.vmem %s1781_s0, %s1486_s30  ;;  %s423_s22 = scalar_lea.vmem %s1782_s1, %s1486_s30  ;;  %vm499_vm0 = vcmask 523264   ;;  %v1504_v41 = vand.u32 127, %v497_v40 }
  0x19   : > { %v433_v3 = vld [vmem:[%s417_s14] sm:$0xff]  ;;  %v434_v4 = vld [vmem:[%s417_s14 + $0x8] sm:$0xff]  ;;  %s410_s29 = sand.u32 1, %s1362_s18  }
  0x1a   : > { %454 = vperm.xlu1 %1286, %v433_v3   ;;  %438 = vperm.xlu0 %1285, %v433_v3   ;;  %v483_v5 = vld [vmem:[%s423_s22] sm:$0xff]  ;;  %v484_v6 = vld [vmem:[%s423_s22 + $0x8] sm:$0xff]  ;;  %s429_s22 = scalar_lea.vmem %s1770_s5, %s1486_s30  ;;  %s1125_s14 = sshll.u32 %s410_s29, 4 }
  0x1b   : > { %469 = vperm.xlu2 %1287, %v433_v3   ;;  %s1240_s30 = sshll.u32 %s1458_s21, 4  ;;  %s412_s15 = scalar_lea.vmem [#allocation2], %s1125_s14 }
  0x1c   : > { %s1031_s24 = scalar_lea.hbm %s1776_s11, %s1240_s30  ;;  %s1032_s25 = sshll.u32 %s412_s15, 4  ;;  %s1033_s25 = int_to_ptr.vmem [resolvable:$true] %s1032_s25 }
  0x1d   : > { %s1034_s0 = sshll.u32 %s1031_s24, 4  ;;  %s1020_s12 = scalar_lea.sflag [#allocation3], %s410_s29  ;;  %s1035_s0 = int_to_ptr.hbm [resolvable:$true] %s1034_s0 }
  0x1e   : > { %s1322_s13 = sshra.s32 %s1035_s0, 4  ;;  %s1328_s30 = scalar_lea.hbm %s1776_s11, 128  ;;  %s1323_s13 = int_to_ptr.hbm [resolvable:$true] %s1322_s13 }
  0x1f   : > { %s1324_s21 = scalar_lea.hbm %s1323_s13, 16  ;;  %p1329_p0 = scmp.lt.s32.totalorder %s1323_s13, %s1776_s11 }
  0x20   : > { %p1325_p11 = scmp.ne.s32.totalorder %s1323_s13, %s1324_s21  ;;  %p1330_p1 = scmp.lt.s32.totalorder %s1328_s30, %s1324_s21 }
  0x22   : > { %458 = vperm.xlu1 %1286, %v434_v4   ;;  %443 = vperm.xlu0 %1285, %v434_v4   ;;  %p1326_p12 = pnand %p1325_p11, %p1475_p5  ;;  %p1331_p2 = por %p1330_p1, %p1329_p0 }
  0x23   : > { %473 = vperm.xlu2 %1287, %v434_v4  }
  0x24   : > { %p1327_p13 = pneg %p1326_p12 }
  0x26   : > { %p1332_p3 = pnand %p1331_p2, %p1327_p13 }
  0x2a   : > { %1288 = vset.pattern.permute.xlu1 %v1373_v1  ;;  %487 = vperm.xlu0 %1285, %v483_v5  }
  0x2b   : > { %490 = vperm.xlu1 %1288, %v484_v6  }
  0x75   : > { %v470_v8 = vpop.permute.xlu2 %469 }
  0x76   : > { %v477_v17 = vsub.f32 %v470_v8, %v476_v13 }
  0x78   : > { %v479_v27 = vmul.f32 %v477_v17, %v477_v17 }
  0x7d   : > { %v474_v16 = vpop.permute.xlu2 %473 }
  0x7e   : > { %v478_v24 = vsub.f32 %v474_v16, %v476_v13 }
  0x80   : > { %v480_v31 = vmul.f32 %v478_v24, %v478_v24 }
  0x8c   : > { %v455_v10 = vpop.permute.xlu1 %454  ;;  %v439_v12 = vpop.permute.xlu0 %438 }
  0x8d   : > { %v462_v14 = vsub.f32 %v455_v10, %v461_v9  ;;  %v447_v15 = vsub.f32 %v439_v12, %v446_v11 }
  0x8f   : > { %v464_v18 = vmul.f32 %v462_v14, %v462_v14  ;;  %v449_v19 = vmul.f32 %v447_v15, %v447_v15 }
  0x91   : > { %v466_v28 = vadd.f32 %v464_v18, %v449_v19 }
  0x93   : > { %v481_v32 = vadd.f32 %v479_v27, %v466_v28 }
  0x94   : > { %v459_v20 = vpop.permute.xlu1 %458  ;;  %v444_v21 = vpop.permute.xlu0 %443 }
  0x95   : > { %v463_v22 = vsub.f32 %v459_v20, %v461_v9  ;;  %v448_v23 = vsub.f32 %v444_v21, %v446_v11 }
  0x97   : > { %v465_v25 = vmul.f32 %v463_v22, %v463_v22  ;;  %v450_v26 = vmul.f32 %v448_v23, %v448_v23 }
  0x99   : > { %v467_v29 = vadd.f32 %v465_v25, %v450_v26 }
  0x9b   : > { %v482_v35 = vadd.f32 %v480_v31, %v467_v29 }
  0x9c   : > { %v488_v33 = vpop.permute.xlu0 %487 }
  0x9d   : > { %vm493_vm1 = vcmp.eq.s32.totalorder %v488_v33, %v1289_v30  ;;  %v491_v34 = vpop.permute.xlu1 %490 }
  0x9e   : > { %v495_v36 = vsel %vm493_vm1, %v481_v32, inf  ;;  %vm494_vm2 = vcmp.eq.s32.totalorder %v491_v34, %v1289_v30 }
  0x9f   : > { %v496_v37 = vsel %vm494_vm2, %v482_v35, inf  ;;  %v500_v38 = vsel %vm499_vm0, %v495_v36, inf }
  0xa0   : > { %501 = vmin.xlane.f32.xlu2 %v500_v38  ;;  %v503_v39 = vsel %vm499_vm0, %v496_v37, inf }
  0xa1   : > { %504 = vmin.xlane.f32.xlu0 %v503_v39 }
 0x113   : > { %v1506_v42 = vpop.xlane.xlu2 %501 }
 0x114   : > { %vm506_vm3 = vcmp.eq.f32.partialorder %v495_v36, %v1506_v42  ;;  %v1509_v43 = vpop.xlane.xlu0 %504  ;;  %v542_v28 = vmax.f32 %v1506_v42, 1e-16 }
 0x115   : > { %v508_v44 = vsel %vm506_vm3, %v1504_v41, 64  ;;  %vm507_vm4 = vcmp.eq.f32.partialorder %v496_v37, %v1509_v43  ;;  %v543_v29 = vmax.f32 %v1509_v43, 1e-16 }
 0x116   : > { %v509_v45 = vsel %vm507_vm4, %v1504_v41, 64  ;;  %v510_v46 = vsel %vm499_vm0, %v508_v44, 2147483647  ;;  %1292 = vrcp.f32 %v542_v28  ;;  %vm549_vm14 = vweird.f32 %v542_v28 }
 0x117   : > { %v512_v47 = vshra.s32 %v510_v46, 16  ;;  %v525_v48 = vsel %vm499_vm0, %v509_v45, 2147483647  ;;  %v511_v52 = vand.u32 65535, %v510_v46  ;;  %1294 = vrcp.f32 %v543_v29 }
 0x118   : > { %v527_v49 = vshra.s32 %v525_v48, 16  ;;  %v526_v53 = vand.u32 65535, %v525_v48  ;;  %v555_v48 = vand.u32 2147483648, %v542_v28  ;;  %vm564_vm15 = vweird.f32 %v543_v29 }
 0x119   : > { %v514_v50 = vcvt.s32.f32 %v512_v47  ;;  %v513_v55 = vcvt.s32.f32 %v511_v52  ;;  %v553_v47 = vand.u32 2147483647, %v542_v28 }
 0x11a   : > { %v529_v51 = vcvt.s32.f32 %v527_v49  ;;  %v528_v57 = vcvt.s32.f32 %v526_v53  ;;  %v568_v49 = vand.u32 2147483647, %v543_v29 }
 0x11b   : > { %515 = vmin.xlane.f32.xlu1 %v514_v50  ;;  %vm1568_vm2 = vcmp.eq.f32.partialorder %v553_v47, 8.507059e+37 }
 0x11c   : > { %530 = vmin.xlane.f32.xlu2 %v529_v51  ;;  %v1293_v32 = vpop.eup %1292  ;;  %vm1572_vm3 = vcmp.eq.f32.partialorder %v568_v49, 8.507059e+37 }
 0x11d   : > { %v1295_v33 = vpop.eup %1294  ;;  %v545_v35 = vmul.f32 %v1293_v32, %v542_v28  ;;  %vm550_vm13 = vweird.f32 %v1293_v32 }
 0x11e   : > { %vm565_vm1 = vweird.f32 %v1295_v33  ;;  %vm1577_vm4 = vmor %vm549_vm14, %vm550_vm13 }
 0x11f   : > { %v546_v39 = vsub.f32 1.0, %v545_v35 }
 0x121   : > { %v547_v44 = vmul.f32 %v1293_v32, %v546_v39 }
 0x123   : > { %v548_v52 = vadd.f32 %v1293_v32, %v547_v44  ;;  %v1223_v44 = vld [vmem:[%s1769_s4 + $0x18] sm:$0xff] }
 0x124   : > { %778 = vmatpush.bf16.msra.mxu0 %v1223_v44  ;;  %v1239_v44 = vld [vmem:[%s1774_s9 + $0x38] sm:$0xff] }
 0x125   : > { %1001 = vmatpush.bf16.msra.mxu3 %v1239_v44 }
 0x18e   : > { %v516_v54 = vpop.xlane.xlu1 %515 }
 0x18f   : > { %v531_v56 = vpop.xlane.xlu2 %530  ;;  %vm517_vm5 = vcmp.eq.f32.partialorder %v514_v50, %v516_v54  ;;  %v522_v60 = vcvt.f32.s32 %v516_v54  ;;  %v570_v50 = vand.u32 2147483648, %v543_v29 }
 0x190   : > { %v518_v58 = vsel %vm517_vm5, %v513_v55, inf  ;;  %vm532_vm6 = vcmp.eq.f32.partialorder %v529_v51, %v531_v56  ;;  %v537_v61 = vcvt.f32.s32 %v531_v56  ;;  %v556_v56 = vor.u32 1.1754944e-38, %v555_v48  ;;  %v1221_v55 = vld [vmem:[%s1769_s4 + $0x8] sm:$0xff] }
 0x191   : > { %519 = vmin.xlane.f32.xlu2 %v518_v58  ;;  %v533_v59 = vsel %vm532_vm6, %v528_v57, inf  ;;  %v523_v63 = vshll.u32 %v522_v60, 16  ;;  %v571_v60 = vor.u32 1.1754944e-38, %v570_v50  ;;  %vm1586_vm6 = vmor %vm564_vm15, %vm565_vm1  ;;  %v1220_v57 = vld [vmem:[%s1769_s4] sm:$0xff] }
 0x192   : > { %534 = vmin.xlane.f32.xlu0 %v533_v59  ;;  %v538_v2 = vshll.u32 %v537_v61, 16  ;;  %v1227_v59 = vld [vmem:[%s1771_s6 + $0x18] sm:$0xff] }
 0x193   : > { %914 = vmatpush.bf16.msra.mxu2 %v1227_v59 }
 0x204   : > { %v520_v62 = vpop.xlane.xlu2 %519 }
 0x205   : > { %v521_v0 = vcvt.f32.s32 %v520_v62  ;;  %v535_v1 = vpop.xlane.xlu0 %534 }
 0x206   : > { %v536_v3 = vcvt.f32.s32 %v535_v1 }
 0x207   : > { %v1516_v4 = vadd.s32 %v523_v63, %v521_v0  ;;  %v552_v63 = vsel %vm1577_vm4, %v1293_v32, %v548_v52 }
 0x208   : > { %v1518_v5 = vadd.s32 %v538_v2, %v536_v3 }
 0x209   : > { %vm540_vm7 = vcmp.eq.s32.totalorder %v1504_v41, %v1516_v4 }
 0x20a   : > { %v1525_v6 = vsel %vm540_vm7, inf, %v495_v36  ;;  %vm541_vm8 = vcmp.eq.s32.totalorder %v1504_v41, %v1518_v5 }
 0x20b   : > { %v580_v7 = vsel %vm499_vm0, %v1525_v6, inf  ;;  %v1534_v8 = vsel %vm541_vm8, inf, %v496_v37  ;;  %v560_v37 = vmul.f32 %v1295_v33, %v543_v29 }
 0x20c   : > { %581 = vmin.xlane.f32.xlu1 %v580_v7  ;;  %v583_v9 = vsel %vm499_vm0, %v1534_v8, inf }
 0x20d   : > { %584 = vmin.xlane.f32.xlu2 %v583_v9  ;;  %v561_v42 = vsub.f32 1.0, %v560_v37 }
 0x20f   : > { %v562_v46 = vmul.f32 %v1295_v33, %v561_v42 }
 0x211   : > { %v563_v54 = vadd.f32 %v1295_v33, %v562_v46 }
 0x213   : > { %v567_v3 = vsel %vm1586_vm6, %v1295_v33, %v563_v54 }
 0x27f   : > { %v582_v10 = vpop.xlane.xlu1 %581 }
 0x280   : > { %vm586_vm9 = vcmp.eq.f32.partialorder %v1525_v6, %v582_v10  ;;  %v585_v11 = vpop.xlane.xlu2 %584  ;;  %v1552_v30 = vmax.f32 %v582_v10, 1e-16 }
 0x281   : > { %v588_v12 = vsel %vm586_vm9, %v1504_v41, 64  ;;  %vm587_vm10 = vcmp.eq.f32.partialorder %v1534_v8, %v585_v11  ;;  %v1554_v31 = vmax.f32 %v585_v11, 1e-16 }
 0x282   : > { %v589_v13 = vsel %vm587_vm10, %v1504_v41, 64  ;;  %v590_v14 = vsel %vm499_vm0, %v588_v12, 2147483647  ;;  %1296 = vrcp.f32 %v1552_v30  ;;  %v635_v1 = vand.u32 2147483648, %v1552_v30 }
 0x283   : > { %v592_v15 = vshra.s32 %v590_v14, 16  ;;  %v605_v16 = vsel %vm499_vm0, %v589_v13, 2147483647  ;;  %v591_v20 = vand.u32 65535, %v590_v14  ;;  %1298 = vrcp.f32 %v1554_v31 }
 0x284   : > { %v607_v17 = vshra.s32 %v605_v16, 16  ;;  %v606_v21 = vand.u32 65535, %v605_v16  ;;  %vm629_vm10 = vweird.f32 %v1552_v30  ;;  %v633_v9 = vand.u32 2147483647, %v1552_v30 }
 0x285   : > { %v594_v18 = vcvt.s32.f32 %v592_v15  ;;  %v593_v23 = vcvt.s32.f32 %v591_v20  ;;  %v650_v10 = vand.u32 2147483648, %v1554_v31  ;;  %v648_v15 = vand.u32 2147483647, %v1554_v31 }
 0x286   : > { %v609_v19 = vcvt.s32.f32 %v607_v17  ;;  %v608_v25 = vcvt.s32.f32 %v606_v21  ;;  %v1606_v16 = vsel %vm1568_vm2, %v556_v56, %v552_v63  ;;  %v1619_v21 = vsel %vm1572_vm3, %v571_v60, %v567_v3 }
 0x287   : > { %595 = vmin.xlane.f32.xlu0 %v594_v18  ;;  %vm634_vm14 = vcmp.eq.f32.partialorder %v633_v9, 8.507059e+37  ;;  %v575_v28 = vsel %vm541_vm8, %v1619_v21, 0.0  ;;  %vm649_vm1 = vcmp.eq.f32.partialorder %v648_v15, 8.507059e+37 }
 0x288   : > { %610 = vmin.xlane.f32.xlu1 %v609_v19  ;;  %v1558_v34 = vpop.eup %1296 }
 0x289   : > { %v1560_v36 = vpop.eup %1298  ;;  %v625_v38 = vmul.f32 %v1558_v34, %v1552_v30  ;;  %vm630_vm5 = vweird.f32 %v1558_v34 }
 0x28a   : > { %v640_v40 = vmul.f32 %v1560_v36, %v1554_v31  ;;  %vm645_vm9 = vweird.f32 %v1560_v36 }
 0x28b   : > { %v626_v43 = vsub.f32 1.0, %v625_v38 }
 0x28c   : > { %v641_v45 = vsub.f32 1.0, %v640_v40 }
 0x28d   : > { %v627_v51 = vmul.f32 %v1558_v34, %v626_v43 }
 0x28e   : > { %v642_v53 = vmul.f32 %v1560_v36, %v641_v45  ;;  %v1222_v45 = vld [vmem:[%s1769_s4 + $0x10] sm:$0xff] }
 0x28f   : > { %v628_v62 = vadd.f32 %v1558_v34, %v627_v51  ;;  %779 = vmatpush.bf16.msra.mxu0 %v1222_v45  ;;  %v1238_v45 = vld [vmem:[%s1774_s9 + $0x30] sm:$0xff] }
 0x290   : > { %v643_v2 = vadd.f32 %v1560_v36, %v642_v53  ;;  %1002 = vmatpush.bf16.msra.mxu3 %v1238_v45 }
 0x293   : > { %780 = vmatpush.bf16.msra.mxu0 %v1221_v55 }
 0x297   : > { %781 = vmatpush.bf16.msra.mxu0 %v1220_v57 }
 0x2fa   : > { %v1544_v22 = vpop.xlane.xlu0 %595 }
 0x2fb   : > { %v1546_v24 = vpop.xlane.xlu1 %610  ;;  %vm597_vm11 = vcmp.eq.f32.partialorder %v594_v18, %v1544_v22  ;;  %v602_v58 = vcvt.f32.s32 %v1544_v22 }
 0x2fc   : > { %v598_v26 = vsel %vm597_vm11, %v593_v23, inf  ;;  %vm612_vm12 = vcmp.eq.f32.partialorder %v609_v19, %v1546_v24  ;;  %v617_v61 = vcvt.f32.s32 %v1546_v24  ;;  %vm1598_vm11 = vmor %vm629_vm10, %vm630_vm5  ;;  %v636_v23 = vor.u32 1.1754944e-38, %v635_v1 }
 0x2fd   : > { %599 = vmin.xlane.f32.xlu2 %v598_v26  ;;  %v613_v27 = vsel %vm612_vm12, %v608_v25, inf  ;;  %v603_v11 = vshll.u32 %v602_v58, 16  ;;  %vm644_vm12 = vweird.f32 %v1554_v31  ;;  %v632_v19 = vsel %vm1598_vm11, %v1558_v34, %v628_v62  ;;  %v1231_v58 = vld [vmem:[%s1772_s7 + $0x18] sm:$0xff] }
 0x2fe   : > { %614 = vmin.xlane.f32.xlu0 %v613_v27  ;;  %v618_v17 = vshll.u32 %v617_v61, 16  ;;  %vm1613_vm13 = vmor %vm644_vm12, %vm645_vm9  ;;  %v574_v25 = vsel %vm540_vm7, %v1606_v16, 0.0  ;;  %v651_v27 = vor.u32 1.1754944e-38, %v650_v10  ;;  %v1633_v29 = vsel %vm634_vm14, %v636_v23, %v632_v19  ;;  %873 = vmatpush.bf16.msra.mxu1 %v1231_v58 }
 0x2ff   : > { %v647_v24 = vsel %vm1613_vm13, %v1560_v36, %v643_v2 }
 0x300   : > { %v1640_v4 = vsel %vm649_vm1, %v651_v27, %v647_v24 }
 0x370   : > { %v600_v7 = vpop.xlane.xlu2 %599 }
 0x371   : > { %v601_v12 = vcvt.f32.s32 %v600_v7  ;;  %v615_v13 = vpop.xlane.xlu0 %614 }
 0x372   : > { %v616_v18 = vcvt.f32.s32 %v615_v13 }
 0x373   : > { %v604_v22 = vadd.s32 %v603_v11, %v601_v12 }
 0x374   : > { %v619_v26 = vadd.s32 %v618_v17, %v616_v18 }
 0x375   : > { %vm620_vm15 = vcmp.eq.s32.totalorder %v1504_v41, %v604_v22 }
 0x376   : > { %v658_v30 = vsel %vm620_vm15, inf, %v1525_v6  ;;  %v1637_v31 = vsel %vm620_vm15, %v1633_v29, %v574_v25  ;;  %vm621_vm7 = vcmp.eq.s32.totalorder %v1504_v41, %v619_v26 }
 0x377   : > { %v660_v32 = vsel %vm499_vm0, %v658_v30, inf  ;;  %v659_v33 = vsel %vm621_vm7, inf, %v1534_v8  ;;  %v1645_v5 = vsel %vm621_vm7, %v1640_v4, %v575_v28 }
 0x378   : > { %661 = vmin.xlane.f32.xlu1 %v660_v32  ;;  %v663_v34 = vsel %vm499_vm0, %v659_v33, inf }
 0x379   : > { %664 = vmin.xlane.f32.xlu2 %v663_v34 }
 0x3eb   : > { %v662_v35 = vpop.xlane.xlu1 %661 }
 0x3ec   : > { %vm666_vm8 = vcmp.eq.f32.partialorder %v658_v30, %v662_v35  ;;  %v665_v6 = vpop.xlane.xlu2 %664  ;;  %v702_v54 = vmax.f32 %v662_v35, 1e-16 }
 0x3ed   : > { %v668_v36 = vsel %vm666_vm8, %v1504_v41, 64  ;;  %vm667_vm2 = vcmp.eq.f32.partialorder %v659_v33, %v665_v6  ;;  %v703_v56 = vmax.f32 %v665_v6, 1e-16 }
 0x3ee   : > { %v669_v37 = vsel %vm667_vm2, %v1504_v41, 64  ;;  %v670_v38 = vsel %vm499_vm0, %v668_v36, 2147483647  ;;  %1300 = vrcp.f32 %v702_v54  ;;  %v715_v11 = vand.u32 2147483648, %v702_v54 }
 0x3ef   : > { %v672_v39 = vshra.s32 %v670_v38, 16  ;;  %v685_v8 = vsel %vm499_vm0, %v669_v37, 2147483647  ;;  %v671_v46 = vand.u32 65535, %v670_v38  ;;  %1302 = vrcp.f32 %v703_v56  ;;  %v1230_v37 = vld [vmem:[%s1772_s7 + $0x10] sm:$0xff] }
 0x3f0   : > { %v687_v40 = vshra.s32 %v685_v8, 16  ;;  %v686_v47 = vand.u32 65535, %v685_v8  ;;  %vm709_vm9 = vweird.f32 %v702_v54  ;;  %v713_v14 = vand.u32 2147483647, %v702_v54  ;;  %874 = vmatpush.bf16.msra.mxu1 %v1230_v37 }
 0x3f1   : > { %v674_v42 = vcvt.s32.f32 %v672_v39  ;;  %v673_v49 = vcvt.s32.f32 %v671_v46  ;;  %v730_v15 = vand.u32 2147483648, %v703_v56  ;;  %vm724_vm11 = vweird.f32 %v703_v56 }
 0x3f2   : > { %v689_v43 = vcvt.s32.f32 %v687_v40  ;;  %v688_v51 = vcvt.s32.f32 %v686_v47  ;;  %v728_v20 = vand.u32 2147483647, %v703_v56  ;;  %v716_v26 = vor.u32 1.1754944e-38, %v715_v11  ;;  %v831_v40 = vld [vmem:[%s429_s22] sm:$0xff]  ;;  %v1237_v11 = vld [vmem:[%s1774_s9 + $0x28] sm:$0xff] }
 0x3f3   : > { %675 = vmin.xlane.f32.xlu0 %v674_v42  ;;  %vm714_vm13 = vcmp.eq.f32.partialorder %v713_v14, 8.507059e+37  ;;  %v731_v30 = vor.u32 1.1754944e-38, %v730_v15  ;;  %v656_v36 = vadd.f32 %v1633_v29, %v1606_v16  ;;  %v1225_v16 = vld [vmem:[%s1771_s6 + $0x8] sm:$0xff]  ;;  %1003 = vmatpush.bf16.msra.mxu3 %v1237_v11  ;;  %v1234_v14 = vld [vmem:[%s1774_s9 + $0x10] sm:$0xff] }
 0x3f4   : > { %690 = vmin.xlane.f32.xlu1 %v689_v43  ;;  %v1301_v60 = vpop.eup %1300  ;;  %vm729_vm15 = vcmp.eq.f32.partialorder %v728_v20, 8.507059e+37  ;;  %v1233_v15 = vld [vmem:[%s1774_s9 + $0x8] sm:$0xff] }
 0x3f5   : > { %v1303_v61 = vpop.eup %1302  ;;  %v705_v62 = vmul.f32 %v1301_v60, %v702_v54  ;;  %vm710_vm5 = vweird.f32 %v1301_v60 }
 0x3f6   : > { %v720_v63 = vmul.f32 %v1303_v61, %v703_v56  ;;  %vm725_vm6 = vweird.f32 %v1303_v61  ;;  %vm711_vm10 = vmor %vm709_vm9, %vm710_vm5 }
 0x3f7   : > { %v706_v0 = vsub.f32 1.0, %v705_v62  ;;  %vm726_vm12 = vmor %vm724_vm11, %vm725_vm6 }
 0x3f8   : > { %v721_v1 = vsub.f32 1.0, %v720_v63 }
 0x3f9   : > { %v707_v2 = vmul.f32 %v1301_v60, %v706_v0 }
 0x3fa   : > { %v722_v3 = vmul.f32 %v1303_v61, %v721_v1 }
 0x3fb   : > { %v708_v10 = vadd.f32 %v1301_v60, %v707_v2 }
 0x3fc   : > { %v723_v12 = vadd.f32 %v1303_v61, %v722_v3 }
 0x3fd   : > { %v712_v24 = vsel %vm711_vm10, %v1301_v60, %v708_v10 }
 0x3fe   : > { %v727_v27 = vsel %vm726_vm12, %v1303_v61, %v723_v12  ;;  %v717_v32 = vsel %vm714_vm13, %v716_v26, %v712_v24  ;;  %v1236_v12 = vld [vmem:[%s1774_s9 + $0x20] sm:$0xff] }
 0x3ff   : > { %v732_v33 = vsel %vm729_vm15, %v731_v30, %v727_v27  ;;  %v736_v38 = vadd.f32 %v717_v32, %v656_v36  ;;  %1004 = vmatpush.bf16.msra.mxu3 %v1236_v12 }
 0x401   : > { %v788_v39 = vmax.f32 %v736_v38, 1e-30 }
 0x403   : > { %1304 = vrcp.f32 %v788_v39  ;;  %vm795_vm2 = vweird.f32 %v788_v39  ;;  %v801_v57 = vand.u32 2147483648, %v788_v39  ;;  %v799_v59 = vand.u32 2147483647, %v788_v39 }
 0x405   : > { %v802_v63 = vor.u32 1.1754944e-38, %v801_v57  ;;  %vm800_vm6 = vcmp.eq.f32.partialorder %v799_v59, 8.507059e+37 }
 0x409   : > { %v1305_v46 = vpop.eup %1304 }
 0x40a   : > { %vm796_vm7 = vweird.f32 %v1305_v46 }
 0x466   : > { %v676_v48 = vpop.xlane.xlu0 %675 }
 0x467   : > { %v691_v50 = vpop.xlane.xlu1 %690  ;;  %vm677_vm3 = vcmp.eq.f32.partialorder %v674_v42, %v676_v48  ;;  %v682_v7 = vcvt.f32.s32 %v676_v48  ;;  %v832_v42 = vld [vmem:[%s429_s22 + $0x8] sm:$0xff]  ;;  %v791_v48 = vmul.f32 %v1305_v46, %v788_v39 }
 0x468   : > { %vm692_vm4 = vcmp.eq.f32.partialorder %v689_v43, %v691_v50  ;;  %v678_v52 = vsel %vm677_vm3, %v673_v49, inf  ;;  %v697_v9 = vcvt.f32.s32 %v691_v50  ;;  %v833_v43 = vpack.c.bf16 %v832_v42, %v831_v40  ;;  %vm797_vm3 = vmor %vm795_vm2, %vm796_vm7 }
 0x469   : > { %679 = vmin.xlane.f32.xlu2 %v678_v52  ;;  %v693_v53 = vsel %vm692_vm4, %v688_v51, inf  ;;  %v683_v17 = vshll.u32 %v682_v7, 16  ;;  %v792_v50 = vsub.f32 1.0, %v791_v48 }
 0x46a   : > { %694 = vmin.xlane.f32.xlu0 %v693_v53  ;;  %v698_v22 = vshll.u32 %v697_v9, 16 }
 0x46b   : > { %v793_v52 = vmul.f32 %v1305_v46, %v792_v50 }
 0x46d   : > { %v794_v55 = vadd.f32 %v1305_v46, %v793_v52 }
 0x46f   : > { %v798_v61 = vsel %vm797_vm3, %v1305_v46, %v794_v55 }
 0x470   : > { %v803_v1 = vsel %vm800_vm6, %v802_v63, %v798_v61 }
 0x4dc   : > { %v680_v13 = vpop.xlane.xlu2 %679 }
 0x4dd   : > { %v681_v18 = vcvt.f32.s32 %v680_v13  ;;  %v695_v19 = vpop.xlane.xlu0 %694  ;;  %v1235_v13 = vld [vmem:[%s1774_s9 + $0x18] sm:$0xff] }
 0x4de   : > { %v696_v23 = vcvt.f32.s32 %v695_v19  ;;  %1005 = vmatpush.bf16.msra.mxu3 %v1235_v13 }
 0x4df   : > { %v684_v25 = vadd.s32 %v683_v17, %v681_v18  ;;  %v1232_v17 = vld [vmem:[%s1774_s9] sm:$0xff] }
 0x4e0   : > { %v699_v28 = vadd.s32 %v698_v22, %v696_v23  ;;  %v1290_v22 = vld [vmem:[%s1773_s8] ss:$0 sm:$0xff] }
 0x4e1   : > { %vm700_vm14 = vcmp.eq.s32.totalorder %v1504_v41, %v684_v25 }
 0x4e2   : > { %vm701_vm1 = vcmp.eq.s32.totalorder %v1504_v41, %v699_v28  ;;  %v734_v34 = vsel %vm700_vm14, %v717_v32, %v1637_v31  ;;  %v1226_v41 = vld [vmem:[%s1771_s6 + $0x10] sm:$0xff]  ;;  %v657_v31 = vadd.f32 %v1640_v4, %v1619_v21  ;;  %v1228_v21 = vld [vmem:[%s1772_s7] sm:$0xff]  ;;  %1006 = vmatpush.bf16.msra.mxu3 %v1234_v14 }
 0x4e3   : > { %v735_v35 = vsel %vm701_vm1, %v732_v33, %v1645_v5  ;;  %915 = vmatpush.bf16.msra.mxu2 %v1226_v41  ;;  %v1229_v5 = vld [vmem:[%s1772_s7 + $0x8] sm:$0xff]  ;;  %v1224_v4 = vld [vmem:[%s1771_s6] sm:$0xff] }
 0x4e4   : > { %v738_v6 = vpack.c.bf16 %v735_v35, %v734_v34  ;;  %v737_v29 = vadd.f32 %v732_v33, %v657_v31  ;;  %875 = vmatpush.bf16.msra.mxu1 %v1229_v5  ;;  %v1291_v33 = vld [vmem:[%s1775_s10] ss:$0 sm:$0xff] }
 0x4e6   : > { %1148 = vmatmul.msk.bf16.vlgmr.msra.gmra.mxu0 %vm499_vm0, %v738_v6  ;;  %v789_v8 = vmax.f32 %v737_v29, 1e-30  ;;  %1007 = vmatpush.bf16.msra.mxu3 %v1233_v15 }
 0x4e7   : > { %916 = vmatpush.bf16.msra.mxu2 %v1225_v16 }
 0x4e8   : > { %1306 = vrcp.f32 %v789_v8  ;;  %876 = vmatpush.bf16.msra.mxu1 %v1228_v21  ;;  %v816_v58 = vand.u32 2147483648, %v789_v8  ;;  %vm810_vm4 = vweird.f32 %v789_v8  ;;  %v814_v60 = vand.u32 2147483647, %v789_v8 }
 0x4ea   : > { %v817_v0 = vor.u32 1.1754944e-38, %v816_v58  ;;  %vm815_vm9 = vcmp.eq.f32.partialorder %v814_v60, 8.507059e+37  ;;  %1008 = vmatpush.bf16.msra.mxu3 %v1232_v17 }
 0x4eb   : > { %917 = vmatpush.bf16.msra.mxu2 %v1224_v4  ;;  %1165 = vmatmul.msk.bf16.vlgmr.msra.gmra.mxu1 %vm499_vm0, %v833_v43 }
 0x4ee   : > { %v1307_v47 = vpop.eup %1306 }
 0x4ef   : > { %v806_v49 = vmul.f32 %v1307_v47, %v789_v8  ;;  %vm811_vm8 = vweird.f32 %v1307_v47 }
 0x4f0   : > { %vm812_vm5 = vmor %vm810_vm4, %vm811_vm8 }
 0x4f1   : > { %v807_v51 = vsub.f32 1.0, %v806_v49 }
 0x4f3   : > { %v808_v53 = vmul.f32 %v1307_v47, %v807_v51 }
 0x4f5   : > { %v809_v56 = vadd.f32 %v1307_v47, %v808_v53 }
 0x4f7   : > { %v813_v62 = vsel %vm812_vm5, %v1307_v47, %v809_v56 }
 0x4f8   : > { %v818_v3 = vsel %vm815_vm9, %v817_v0, %v813_v62 }
 0x563   : > { %v783_v54 = vpop.f32.mrf.mxu0 }
 0x564   : > { %v820_v7 = vmul.f32 %v803_v1, %v783_v54 }
 0x568   : > { %v878_v18 = vpop.f32.mrf.mxu1 }
 0x56b   : > { %v785_v2 = vpop.f32.mrf.mxu0 }
 0x56c   : > { %v821_v9 = vmul.f32 %v818_v3, %v785_v2 }
 0x56e   : > { %v822_v10 = vpack.c.bf16 %v821_v9, %v820_v7 }
 0x570   : > { %1182 = vmatmul.msk.bf16.vlgmr.msra.gmra.mxu2 %vm499_vm0, %v822_v10  ;;  %v880_v23 = vpop.f32.mrf.mxu1 }
 0x5f3   : > { %v919_v19 = vpop.f32.mrf.mxu2 }
 0x5f4   : > { %v920_v20 = vadd.f32 %v919_v19, %v878_v18 }
 0x5f6   : > { %v928_v25 = vadd.f32 %v1290_v22, %v920_v20 }
 0x5f8   : > { %v930_v28 = vmax.f32 %v928_v25, 0.0 }
 0x5fb   : > { %v921_v24 = vpop.f32.mrf.mxu2 }
 0x5fc   : > { %v922_v26 = vadd.f32 %v921_v24, %v880_v23 }
 0x5fe   : > { %v929_v27 = vadd.f32 %v1290_v22, %v922_v26 }
 0x600   : > { %v931_v30 = vmax.f32 %v929_v27, 0.0 }
 0x602   : > { %v932_v32 = vpack.c.bf16 %v931_v30, %v930_v28 }
 0x604   : > { %1009 = vmatmul.bf16.vlgmr.msra.gmra.mxu3 %v932_v32 }
 0x687   : > { %v1010_v34 = vpop.f32.mrf.mxu3 }
 0x688   : > { %v1011_v35 = vadd.f32 %v1291_v33, %v1010_v34 }
 0x68a   : > { %v1015_v6 = vmax.f32 %v1011_v35, 0.0 }
 0x68c   : > { %1017 = vst [vmem:[%s412_s15] sm:$0xff] %v1015_v6 }
 0x68f   : > { %v1012_v36 = vpop.f32.mrf.mxu3 }
 0x690   : > { %v1013_v37 = vadd.f32 %v1291_v33, %v1012_v36 }
 0x692   : > { %v1016_v41 = vmax.f32 %v1013_v37, 0.0 }
 0x694   : > { %1018 = vst [vmem:[%s412_s15 + $0x8] sm:$0xff] %v1016_v41 }
 0x695   : > { %1335 = shalt.err (!%p1332_p3)
}
 0x696   : > { %s1375_s29 = smov 128   ;;  %s1376_s15 = smov 8  }
 0x697   : > { %1241 = dma.vmem_to_hbm [thread:$0]  (%p1475_p5), %s1033_s25, 256, %s1035_s0, %s1020_s12, %s1375_s29, %s1375_s29, %s1376_s15  }
 0x698 PF: > { %p1247_p4 = scmp.ge.s32.totalorder %s1370_s20, 2  ;;  %s1049_s1 = sand.u32 1, %s1358_s17  }
 0x699   : > { %s1050_s24 = scalar_lea.sflag [#allocation3], %s1049_s1 }
 0x69a   : > { %p1244_p7 = pnand %p1247_p4, %p1479_p6 }
 0x69c   : > { %p1245_p8 = pneg %p1244_p7 }
 0x69e   : > { %1353 = dma.done.wait (%p1245_p8), %s1050_s24, 256  }
 0x69f   : > { %1355 = vsyncadd (%p1245_p8), %s1050_s24, 4294967040  ;;  %p21_p9 = scmp.ge.s32.totalorder %s1462_s23, 10   ;;  %s1795_s17 = smov %s1362_s18 }
 0x6a0   : > { %s1796_s18 = smov %s1366_s19  ;;  %s1797_s19 = smov %s1473_s26 }
 0x6a1   : > { %s1798_s20 = smov %s1462_s23  ;;  %23 = sbr.rel (!%p21_p9) target bundleno = 6 (0x6), region = 105 }
 0x6a6   :  { %1056 = vsyncpa [#allocation3], 1 }
 0x6a7   :  { %1058 = vsyncpa [#allocation3 + $0x1], 1 }

</bundles_post_ra>
